<compile_context>
chip_gen: v7x
topology: tpu7x:2x2x1
jax: 0.10.0
libtpu: 0.0.40
codegen_flags: <defaults>
</compile_context>

<pallas_src>
import math
from functools import partial

import jax
import jax.numpy as jnp
from jax import lax
from jax.experimental import pallas as pl
from jax.experimental.pallas import tpu as pltpu

# ---------------- config (OnlinePreprocessor feat args, small synthetic sizes) -------------
N_FFT = 64
HOP = 32                       # preprocessor._win_args['hop_length']
N_FREQ = N_FFT // 2 + 1        # 33 == feat_size (true freq bins)
F_PAD = 64                     # freq dim zero-padded for lane alignment / MXU K,N
HIDDEN = 32                    # LSTM hidden size (4H = 128 = one lane width)
TC = 8                         # LSTM time-chunk per grid step
R_STFT = 32                    # row tile for the STFT+gates kernel
R_HEAD = 16                    # row tile for the head+loss kernel


# ---------------- kernel 1: STFT magnitude + hoisted LSTM input projection ------------------
def stft_gates_kernel(frames_ref, basis_ref, wih_ref, b_ref, mag_ref, gx_ref):
    # fused cos|sin basis: one (R, n_fft) @ (n_fft, 128) MXU matmul, then static lane split
    z = jnp.dot(frames_ref[...], basis_ref[...], preferred_element_type=jnp.float32)
    re = z[:, :F_PAD]
    im = z[:, F_PAD:]
    mag = jnp.sqrt(re * re + im * im + 1e-12)
    mag_ref[...] = mag
    # hoisted input projection for the LSTM (wasted on target rows, but avoids an HBM
    # round-trip of feat_inp and keeps M = T*2B rows feeding the MXU)
    gx_ref[...] = (jnp.dot(mag, wih_ref[...], preferred_element_type=jnp.float32)
                   + b_ref[...])


def stft_and_gates(frames2d, basis, wih_pad, bias):
    n, n_fft = frames2d.shape
    n_pad = -(-n // R_STFT) * R_STFT
    if n_pad != n:
        frames2d = jnp.pad(frames2d, ((0, n_pad - n), (0, 0)))
    mag, gx = pl.pallas_call(
        stft_gates_kernel,
        out_shape=(jax.ShapeDtypeStruct((n_pad, F_PAD), jnp.float32),
                   jax.ShapeDtypeStruct((n_pad, 4 * HIDDEN), jnp.float32)),
        grid=(n_pad // R_STFT,),
        in_specs=[pl.BlockSpec((R_STFT, n_fft), lambda i: (i, 0)),
                  pl.BlockSpec((n_fft, 2 * F_PAD), lambda i: (0, 0)),
                  pl.BlockSpec((F_PAD, 4 * HIDDEN), lambda i: (0, 0)),
                  pl.BlockSpec((1, 4 * HIDDEN), lambda i: (0, 0))],
        out_specs=(pl.BlockSpec((R_STFT, F_PAD), lambda i: (i, 0)),
                   pl.BlockSpec((R_STFT, 4 * HIDDEN), lambda i: (i, 0))),
        compiler_params=pltpu.CompilerParams(dimension_semantics=("parallel",)),
    )(frames2d, basis, wih_pad, bias)
    return mag[:n], gx[:n]


# ---------------- kernel 2: LSTM recurrence only (h @ W_hh on the serial path) ---------------
def lstm_kernel(gx_ref, whh_ref, h_out_ref, h_sc, c_sc):
    H = h_sc.shape[1]

    @pl.when(pl.program_id(0) == 0)
    def _():
        h_sc[...] = jnp.zeros_like(h_sc)
        c_sc[...] = jnp.zeros_like(c_sc)

    whh = whh_ref[...]                       # hoisted: stays resident in vregs (~4 vregs)

    def step(t, carry):
        h, c = carry
        gates = gx_ref[t] + jnp.dot(h, whh, preferred_element_type=jnp.float32)  # (B, 4H)
        # full-vreg activations on EUP, then static lane slices (gate order: i, f, g, o)
        sg = jax.nn.sigmoid(gates)
        tg = jnp.tanh(gates)
        i_g = sg[:, 0 * H:1 * H]
        f_g = sg[:, 1 * H:2 * H]
        o_g = sg[:, 3 * H:4 * H]
        g_g = tg[:, 2 * H:3 * H]
        c = f_g * c + i_g * g_g
        h = o_g * jnp.tanh(c)
        h_out_ref[t] = h
        return (h, c)

    h_fin, c_fin = lax.fori_loop(0, gx_ref.shape[0], step,
                                 (h_sc[...], c_sc[...]), unroll=True)
    h_sc[...] = h_fin                        # persist state across time chunks
    c_sc[...] = c_fin


def lstm_recurrence(gx_tm, whh_t):
    t_pad, b, g4 = gx_tm.shape
    h = whh_t.shape[0]
    return pl.pallas_call(
        lstm_kernel,
        out_shape=jax.ShapeDtypeStruct((t_pad, b, h), jnp.float32),
        grid=(t_pad // TC,),
        in_specs=[pl.BlockSpec((TC, b, g4), lambda i: (i, 0, 0)),
                  pl.BlockSpec((h, g4), lambda i: (0, 0))],
        out_specs=pl.BlockSpec((TC, b, h), lambda i: (i, 0, 0)),
        scratch_shapes=[pltpu.VMEM((b, h), jnp.float32),    # h state (persists over grid)
                        pltpu.VMEM((b, h), jnp.float32)],   # c state
        compiler_params=pltpu.CompilerParams(dimension_semantics=("arbitrary",)),
    )(gx_tm, whh_t)


# ---------------- kernel 3: fused output projection + masked MSE reduction -------------------
def head_loss_kernel(h_ref, wout_ref, bout_ref, tar_ref, tmask_ref, loss_ref, *, inv_n, n_freq):
    i = pl.program_id(0)

    @pl.when(i == 0)
    def _():
        loss_ref[0] = jnp.float32(0.0)

    pred = (jnp.dot(h_ref[...], wout_ref[...], preferred_element_type=jnp.float32)
            + bout_ref[...])                             # (R, F_PAD), one wide matmul
    d = (pred - tar_ref[...]) * tmask_ref[...]           # mask both tensors: (p-t)*m
    lane = lax.broadcasted_iota(jnp.int32, d.shape, 1)
    d = jnp.where(lane < n_freq, d, 0.0)                 # drop zero-padded freq lanes
    loss_ref[0] += jnp.sum(d * d) * inv_n                # MSELoss(reduction='mean')


def head_and_loss(h2d, wout_pad, bout_pad, tar2d, tmask2d, n_valid):
    n, hdim = h2d.shape
    n_pad = -(-n // R_HEAD) * R_HEAD
    if n_pad != n:
        p = n_pad - n
        h2d = jnp.pad(h2d, ((0, p), (0, 0)))
        tar2d = jnp.pad(tar2d, ((0, p), (0, 0)))
        tmask2d = jnp.pad(tmask2d, ((0, p), (0, 0)))     # zero mask -> no contribution
    out = pl.pallas_call(
        partial(head_loss_kernel, inv_n=1.0 / float(n_valid), n_freq=N_FREQ),
        out_shape=jax.ShapeDtypeStruct((1,), jnp.float32),
        grid=(n_pad // R_HEAD,),
        in_specs=[pl.BlockSpec((R_HEAD, hdim), lambda i: (i, 0)),
                  pl.BlockSpec((hdim, F_PAD), lambda i: (0, 0)),
                  pl.BlockSpec((1, F_PAD), lambda i: (0, 0)),
                  pl.BlockSpec((R_HEAD, F_PAD), lambda i: (i, 0)),
                  pl.BlockSpec((R_HEAD, 1), lambda i: (i, 0))],
        out_specs=pl.BlockSpec(memory_space=pltpu.SMEM),
        compiler_params=pltpu.CompilerParams(dimension_semantics=("arbitrary",)),
    )(h2d, wout_pad, bout_pad, tar2d, tmask2d)
    return out[0]


# ---------------- glue: fused DFT basis & parameter init ------------------------------------
def make_fused_dft_basis():
    n = jnp.arange(N_FFT, dtype=jnp.float32)[:, None]
    k = jnp.arange(N_FREQ, dtype=jnp.float32)[None, :]
    ang = 2.0 * jnp.pi * n * k / N_FFT
    basis = jnp.zeros((N_FFT, 2 * F_PAD), jnp.float32)
    basis = basis.at[:, :N_FREQ].set(jnp.cos(ang))
    basis = basis.at[:, F_PAD:F_PAD + N_FREQ].set(-jnp.sin(ang))
    return basis


def init_params(key, feat_size=N_FREQ, hidden=HIDDEN):
    k1, k2, k3 = jax.random.split(key, 3)

    def xavier(k, shape):  # shape = (fan_out, fan_in)
        a = math.sqrt(6.0 / (shape[0] + shape[1]))
        return jax.random.uniform(k, shape, jnp.float32, -a, a)

    w_ih = xavier(k1, (4 * hidden, feat_size))                                       # xavier
    w_hh = jax.nn.initializers.orthogonal()(k2, (4 * hidden, hidden), jnp.float32)   # orthogonal
    w_out = xavier(k3, (feat_size, hidden))
    # pre-transposed and zero-padded to lane-friendly shapes
    w_ih_t = jnp.zeros((F_PAD, 4 * hidden), jnp.float32).at[:feat_size, :].set(w_ih.T)
    w_out_t = jnp.zeros((hidden, F_PAD), jnp.float32).at[:, :feat_size].set(w_out.T)
    b = jnp.zeros((1, 4 * hidden), jnp.float32)              # b_ih + b_hh = 0
    b_out = jnp.zeros((1, F_PAD), jnp.float32)
    return dict(w_ih_t=w_ih_t, w_hh_t=w_hh.T, b=b, w_out_t=w_out_t, b_out=b_out)


# ---------------- full forward (SpectrumDenoiseModel.forward) --------------------------------
@jax.jit
def spectrum_denoise_forward(wav, target, lengths, params, basis):
    B, L = wav.shape
    T = L // HOP + 1
    T_pad = -(-T // TC) * TC

    # framing for wav+target in one pass (torch.stft(center=True)-style, periodic Hann)
    w_all = jnp.concatenate([wav, target], axis=0)                      # (2B, L)
    pad = N_FFT // 2
    w_all = jnp.pad(w_all, ((0, 0), (pad, pad)), mode="reflect")
    idx = jnp.arange(T)[:, None] * HOP + jnp.arange(N_FFT)[None, :]
    frames = w_all[:, idx]                                              # (2B, T, n_fft)
    n = jnp.arange(N_FFT, dtype=jnp.float32)
    window = 0.5 - 0.5 * jnp.cos(2.0 * jnp.pi * n / N_FFT)
    frames = frames * window[None, None, :]
    frames = jnp.transpose(frames, (1, 0, 2))                           # time-major (T, 2B, n_fft)
    frames = jnp.pad(frames, ((0, T_pad - T), (0, 0), (0, 0)))
    frames2d = frames.reshape(T_pad * 2 * B, N_FFT).astype(jnp.float32)

    # K1: STFT magnitude + hoisted LSTM input projection (single pallas_call for wav & target)
    mag2d, gx2d = stft_and_gates(frames2d, basis, params["w_ih_t"], params["b"])
    mag = mag2d.reshape(T_pad, 2 * B, F_PAD)
    gx = gx2d.reshape(T_pad, 2 * B, 4 * HIDDEN)
    feat_tar = mag[:, B:, :]                                            # (T_pad, B, F_PAD)
    gx_inp = gx[:, :B, :]                                               # (T_pad, B, 4H)

    # K2: recurrence only, time-chunked grid with persistent h/c scratch
    h_all = lstm_recurrence(gx_inp, params["w_hh_t"])                   # (T_pad, B, H)

    # _mask: stft_lengths = lengths // hop + 1 (padded frames t >= T are masked out naturally)
    stft_lengths = lengths // HOP + 1
    tmask = (jnp.arange(T_pad)[:, None] < stft_lengths[None, :]).astype(jnp.float32)

    # K3: output projection + masked MSE fused (no (B,T,F) predicted writeback / transpose)
    h2d = h_all.reshape(T_pad * B, HIDDEN)
    tar2d = feat_tar.reshape(T_pad * B, F_PAD)
    tmask2d = tmask.reshape(T_pad * B, 1)
    return head_and_loss(h2d, params["w_out_t"], params["b_out"], tar2d, tmask2d,
                         n_valid=B * T * N_FREQ)


if __name__ == "__main__":
    key = jax.random.PRNGKey(0)
    kp, kt, kn = jax.random.split(key, 3)

    B, L = 2, 256                                    # T = 256//32 + 1 = 9 frames (padded to 16)
    params = init_params(kp)
    basis = make_fused_dft_basis()

    target = jax.random.normal(kt, (B, L), jnp.float32)                  # clean waveform
    wav = target + 0.1 * jax.random.normal(kn, (B, L), jnp.float32)      # noisy waveform
    lengths = jnp.array([256, 200], dtype=jnp.int32)

    loss = spectrum_denoise_forward(wav, target, lengths, params, basis)
    jax.block_until_ready(loss)
    assert loss.shape == () and jnp.isfinite(loss)
    print("KERNEL_OK")
</pallas_src>

<mosaic_0001>
module attributes {stable_mosaic.version = 11 : i64} {
  func.func @head_loss_kernel(%arg0: i32, %arg1: memref<16x32xf32, #tpu.memory_space<vmem>>, %arg2: memref<32x64xf32, #tpu.memory_space<vmem>>, %arg3: memref<1x64xf32, #tpu.memory_space<vmem>>, %arg4: memref<16x64xf32, #tpu.memory_space<vmem>>, %arg5: memref<16x1xf32, #tpu.memory_space<vmem>>, %arg6: memref<1xf32, #tpu.memory_space<smem>>) attributes {dimension_semantics = [#tpu.dimension_semantics<arbitrary>], iteration_bounds = array<i64: 2>, scalar_prefetch = 0 : i64, scratch_operands = 0 : i64, tpu.core_type = #tpu.core_type<tc>, window_params = [{transform_indices = @transform_0, window_bounds = array<i64: 16, 32>}, {pipeline_mode = #tpu.pipeline_mode<synchronous>, transform_indices = @transform_1, window_bounds = array<i64: 32, 64>}, {pipeline_mode = #tpu.pipeline_mode<synchronous>, transform_indices = @transform_2, window_bounds = array<i64: 1, 64>}, {transform_indices = @transform_3, window_bounds = array<i64: 16, 64>}, {transform_indices = @transform_4, window_bounds = array<i64: 16, 1>}, {transform_indices = @transform_5, window_bounds = array<i64: 1>}]} {
    %c0_i32 = arith.constant 0 : i32
    %0 = arith.cmpi eq, %arg0, %c0_i32 : i32
    %1 = arith.extui %0 : i1 to i32
    %c0_i32_0 = arith.constant 0 : i32
    %2 = arith.cmpi ne, %1, %c0_i32_0 : i32
    scf.if %2 {
      %cst_15 = arith.constant 0.000000e+00 : f32
      %c0_16 = arith.constant 0 : index
      %28 = memref.load %arg6[%c0_16] : memref<1xf32, #tpu.memory_space<smem>>
      memref.store %cst_15, %arg6[%c0_16] : memref<1xf32, #tpu.memory_space<smem>>
    } else {
    }
    %c0 = arith.constant 0 : index
    %c0_1 = arith.constant 0 : index
    %3 = vector.load %arg1[%c0, %c0_1] : memref<16x32xf32, #tpu.memory_space<vmem>>, vector<16x32xf32>
    %c0_2 = arith.constant 0 : index
    %c0_3 = arith.constant 0 : index
    %4 = vector.load %arg2[%c0_2, %c0_3] : memref<32x64xf32, #tpu.memory_space<vmem>>, vector<32x64xf32>
    %cst = arith.constant dense<0.000000e+00> : vector<16x64xf32>
    %5 = tpu.matmul %3, %4, %cst {dimension_numbers = #tpu.dot_dimension_numbers<[1], [0], [0], [1], [0, 0, 1, 1], [], []>} : vector<16x32xf32>, vector<32x64xf32>, vector<16x64xf32> -> vector<16x64xf32>
    %c0_4 = arith.constant 0 : index
    %c0_5 = arith.constant 0 : index
    %6 = vector.load %arg3[%c0_4, %c0_5] : memref<1x64xf32, #tpu.memory_space<vmem>>, vector<1x64xf32>
    %7 = vector.broadcast %6 : vector<1x64xf32> to vector<16x64xf32>
    %8 = arith.addf %5, %7 : vector<16x64xf32>
    %c0_6 = arith.constant 0 : index
    %c0_7 = arith.constant 0 : index
    %9 = vector.load %arg4[%c0_6, %c0_7] : memref<16x64xf32, #tpu.memory_space<vmem>>, vector<16x64xf32>
    %10 = arith.subf %8, %9 : vector<16x64xf32>
    %c0_8 = arith.constant 0 : index
    %c0_9 = arith.constant 0 : index
    %11 = vector.load %arg5[%c0_8, %c0_9] : memref<16x1xf32, #tpu.memory_space<vmem>>, vector<16x1xf32>
    %12 = vector.broadcast %11 : vector<16x1xf32> to vector<16x64xf32>
    %13 = arith.mulf %10, %12 : vector<16x64xf32>
    %14 = tpu.iota {dimensions = array<i32: 1>} : vector<16x64xi32>
    %c33_i32 = arith.constant 33 : i32
    %15 = vector.broadcast %c33_i32 : i32 to vector<16x64xi32>
    %16 = arith.cmpi slt, %14, %15 : vector<16x64xi32>
    %cst_10 = arith.constant 0.000000e+00 : f32
    %17 = vector.broadcast %cst_10 : f32 to vector<16x64xf32>
    %18 = arith.select %16, %13, %17 : vector<16x64xi1>, vector<16x64xf32>
    %c0_11 = arith.constant 0 : index
    %19 = memref.load %arg6[%c0_11] : memref<1xf32, #tpu.memory_space<smem>>
    %20 = arith.mulf %18, %18 : vector<16x64xf32>
    %21 = vector.shape_cast %20 : vector<16x64xf32> to vector<1x16x64xf32>
    %cst_12 = arith.constant dense<0.000000e+00> : vector<1xf32>
    %22 = vector.multi_reduction <add>, %21, %cst_12 [1, 2] : vector<1x16x64xf32> to vector<1xf32>
    %23 = vector.shape_cast %22 : vector<1xf32> to vector<1x1x1xf32>
    %24 = vector.extract %23[0, 0, 0] : f32 from vector<1x1x1xf32>
    %cst_13 = arith.constant 0.00168350164 : f32
    %25 = arith.mulf %24, %cst_13 : f32
    %26 = arith.addf %19, %25 : f32
    %c0_14 = arith.constant 0 : index
    %27 = memref.load %arg6[%c0_14] : memref<1xf32, #tpu.memory_space<smem>>
    memref.store %26, %arg6[%c0_14] : memref<1xf32, #tpu.memory_space<smem>>
    return
  }
  func.func @transform_0(%arg0: i32) -> (i32, i32) {
    %c0_i32 = arith.constant 0 : i32
    %c0_i32_0 = arith.constant 0 : i32
    return %arg0, %c0_i32 : i32, i32
  }
  func.func @transform_1(%arg0: i32) -> (i32, i32) {
    %c0_i32 = arith.constant 0 : i32
    %c0_i32_0 = arith.constant 0 : i32
    %c0_i32_1 = arith.constant 0 : i32
    return %c0_i32, %c0_i32_0 : i32, i32
  }
  func.func @transform_2(%arg0: i32) -> (i32, i32) {
    %c0_i32 = arith.constant 0 : i32
    %c0_i32_0 = arith.constant 0 : i32
    %c0_i32_1 = arith.constant 0 : i32
    return %c0_i32, %c0_i32_0 : i32, i32
  }
  func.func @transform_3(%arg0: i32) -> (i32, i32) {
    %c0_i32 = arith.constant 0 : i32
    %c0_i32_0 = arith.constant 0 : i32
    return %arg0, %c0_i32 : i32, i32
  }
  func.func @transform_4(%arg0: i32) -> (i32, i32) {
    %c0_i32 = arith.constant 0 : i32
    %c0_i32_0 = arith.constant 0 : i32
    return %arg0, %c0_i32 : i32, i32
  }
  func.func @transform_5(%arg0: i32) -> i32 {
    %c0_i32 = arith.constant 0 : i32
    %c0_i32_0 = arith.constant 0 : i32
    return %c0_i32 : i32
  }
}

module attributes {stable_mosaic.version = 11 : i64} {
  func.func @stft_gates_kernel(%arg0: i32, %arg1: memref<32x64xf32, #tpu.memory_space<vmem>>, %arg2: memref<64x128xf32, #tpu.memory_space<vmem>>, %arg3: memref<64x128xf32, #tpu.memory_space<vmem>>, %arg4: memref<1x128xf32, #tpu.memory_space<vmem>>, %arg5: memref<32x64xf32, #tpu.memory_space<vmem>>, %arg6: memref<32x128xf32, #tpu.memory_space<vmem>>) attributes {dimension_semantics = [#tpu.dimension_semantics<parallel>], iteration_bounds = array<i64: 2>, scalar_prefetch = 0 : i64, scratch_operands = 0 : i64, tpu.core_type = #tpu.core_type<tc>, window_params = [{transform_indices = @transform_0, window_bounds = array<i64: 32, 64>}, {pipeline_mode = #tpu.pipeline_mode<synchronous>, transform_indices = @transform_1, window_bounds = array<i64: 64, 128>}, {pipeline_mode = #tpu.pipeline_mode<synchronous>, transform_indices = @transform_2, window_bounds = array<i64: 64, 128>}, {pipeline_mode = #tpu.pipeline_mode<synchronous>, transform_indices = @transform_3, window_bounds = array<i64: 1, 128>}, {transform_indices = @transform_4, window_bounds = array<i64: 32, 64>}, {transform_indices = @transform_5, window_bounds = array<i64: 32, 128>}]} {
    %c0 = arith.constant 0 : index
    %c0_0 = arith.constant 0 : index
    %0 = vector.load %arg1[%c0, %c0_0] : memref<32x64xf32, #tpu.memory_space<vmem>>, vector<32x64xf32>
    %c0_1 = arith.constant 0 : index
    %c0_2 = arith.constant 0 : index
    %1 = vector.load %arg2[%c0_1, %c0_2] : memref<64x128xf32, #tpu.memory_space<vmem>>, vector<64x128xf32>
    %cst = arith.constant dense<0.000000e+00> : vector<32x128xf32>
    %2 = tpu.matmul %0, %1, %cst {dimension_numbers = #tpu.dot_dimension_numbers<[1], [0], [0], [1], [0, 0, 1, 1], [], []>} : vector<32x64xf32>, vector<64x128xf32>, vector<32x128xf32> -> vector<32x128xf32>
    %3 = vector.extract_strided_slice %2 {offsets = [0, 0], sizes = [32, 64], strides = [1, 1]} : vector<32x128xf32> to vector<32x64xf32>
    %4 = vector.extract_strided_slice %2 {offsets = [0, 64], sizes = [32, 64], strides = [1, 1]} : vector<32x128xf32> to vector<32x64xf32>
    %5 = arith.mulf %3, %3 : vector<32x64xf32>
    %6 = arith.mulf %4, %4 : vector<32x64xf32>
    %7 = arith.addf %5, %6 : vector<32x64xf32>
    %cst_3 = arith.constant 9.99999996E-13 : f32
    %8 = vector.broadcast %cst_3 : f32 to vector<32x64xf32>
    %9 = arith.addf %7, %8 : vector<32x64xf32>
    %10 = math.sqrt %9 : vector<32x64xf32>
    %c0_4 = arith.constant 0 : index
    %c0_5 = arith.constant 0 : index
    %11 = vector.load %arg5[%c0_4, %c0_5] : memref<32x64xf32, #tpu.memory_space<vmem>>, vector<32x64xf32>
    tpu.vector_store %arg5[%c0_4, %c0_5], %10 {strides = array<i32>} : memref<32x64xf32, #tpu.memory_space<vmem>>, vector<32x64xf32>,
    %c0_6 = arith.constant 0 : index
    %c0_7 = arith.constant 0 : index
    %12 = vector.load %arg3[%c0_6, %c0_7] : memref<64x128xf32, #tpu.memory_space<vmem>>, vector<64x128xf32>
    %cst_8 = arith.constant dense<0.000000e+00> : vector<32x128xf32>
    %13 = tpu.matmul %10, %12, %cst_8 {dimension_numbers = #tpu.dot_dimension_numbers<[1], [0], [0], [1], [0, 0, 1, 1], [], []>} : vector<32x64xf32>, vector<64x128xf32>, vector<32x128xf32> -> vector<32x128xf32>
    %c0_9 = arith.constant 0 : index
    %c0_10 = arith.constant 0 : index
    %14 = vector.load %arg4[%c0_9, %c0_10] : memref<1x128xf32, #tpu.memory_space<vmem>>, vector<1x128xf32>
    %15 = vector.broadcast %14 : vector<1x128xf32> to vector<32x128xf32>
    %16 = arith.addf %13, %15 : vector<32x128xf32>
    %c0_11 = arith.constant 0 : index
    %c0_12 = arith.constant 0 : index
    %17 = vector.load %arg6[%c0_11, %c0_12] : memref<32x128xf32, #tpu.memory_space<vmem>>, vector<32x128xf32>
    tpu.vector_store %arg6[%c0_11, %c0_12], %16 {strides = array<i32>} : memref<32x128xf32, #tpu.memory_space<vmem>>, vector<32x128xf32>,
    return
  }
  func.func @transform_0(%arg0: i32) -> (i32, i32) {
    %c0_i32 = arith.constant 0 : i32
    %c0_i32_0 = arith.constant 0 : i32
    return %arg0, %c0_i32 : i32, i32
  }
  func.func @transform_1(%arg0: i32) -> (i32, i32) {
    %c0_i32 = arith.constant 0 : i32
    %c0_i32_0 = arith.constant 0 : i32
    %c0_i32_1 = arith.constant 0 : i32
    return %c0_i32, %c0_i32_0 : i32, i32
  }
  func.func @transform_2(%arg0: i32) -> (i32, i32) {
    %c0_i32 = arith.constant 0 : i32
    %c0_i32_0 = arith.constant 0 : i32
    %c0_i32_1 = arith.constant 0 : i32
    return %c0_i32, %c0_i32_0 : i32, i32
  }
  func.func @transform_3(%arg0: i32) -> (i32, i32) {
    %c0_i32 = arith.constant 0 : i32
    %c0_i32_0 = arith.constant 0 : i32
    %c0_i32_1 = arith.constant 0 : i32
    return %c0_i32, %c0_i32_0 : i32, i32
  }
  func.func @transform_4(%arg0: i32) -> (i32, i32) {
    %c0_i32 = arith.constant 0 : i32
    %c0_i32_0 = arith.constant 0 : i32
    return %arg0, %c0_i32 : i32, i32
  }
  func.func @transform_5(%arg0: i32) -> (i32, i32) {
    %c0_i32 = arith.constant 0 : i32
    %c0_i32_0 = arith.constant 0 : i32
    return %arg0, %c0_i32 : i32, i32
  }
}

module attributes {stable_mosaic.version = 11 : i64} {
  func.func @lstm_kernel(%arg0: i32, %arg1: memref<8x2x128xf32, #tpu.memory_space<vmem>>, %arg2: memref<32x128xf32, #tpu.memory_space<vmem>>, %arg3: memref<8x2x32xf32, #tpu.memory_space<vmem>>, %arg4: memref<2x32xf32, #tpu.memory_space<vmem>>, %arg5: memref<2x32xf32, #tpu.memory_space<vmem>>) attributes {dimension_semantics = [#tpu.dimension_semantics<arbitrary>], iteration_bounds = array<i64: 2>, scalar_prefetch = 0 : i64, scratch_operands = 2 : i64, tpu.core_type = #tpu.core_type<tc>, window_params = [{transform_indices = @transform_0, window_bounds = array<i64: 8, 2, 128>}, {pipeline_mode = #tpu.pipeline_mode<synchronous>, transform_indices = @transform_1, window_bounds = array<i64: 32, 128>}, {transform_indices = @transform_2, window_bounds = array<i64: 8, 2, 32>}]} {
    %c0_i32 = arith.constant 0 : i32
    %0 = arith.cmpi eq, %arg0, %c0_i32 : i32
    %1 = arith.extui %0 : i1 to i32
    %c0_i32_0 = arith.constant 0 : i32
    %2 = arith.cmpi ne, %1, %c0_i32_0 : i32
    scf.if %2 {
      %cst_58 = arith.constant 0.000000e+00 : f32
      %200 = vector.broadcast %cst_58 : f32 to vector<2x32xf32>
      %c0_59 = arith.constant 0 : index
      %c0_60 = arith.constant 0 : index
      %201 = vector.load %arg4[%c0_59, %c0_60] : memref<2x32xf32, #tpu.memory_space<vmem>>, vector<2x32xf32>
      tpu.vector_store %arg4[%c0_59, %c0_60], %200 {strides = array<i32>} : memref<2x32xf32, #tpu.memory_space<vmem>>, vector<2x32xf32>,
      %cst_61 = arith.constant 0.000000e+00 : f32
      %202 = vector.broadcast %cst_61 : f32 to vector<2x32xf32>
      %c0_62 = arith.constant 0 : index
      %c0_63 = arith.constant 0 : index
      %203 = vector.load %arg5[%c0_62, %c0_63] : memref<2x32xf32, #tpu.memory_space<vmem>>, vector<2x32xf32>
      tpu.vector_store %arg5[%c0_62, %c0_63], %202 {strides = array<i32>} : memref<2x32xf32, #tpu.memory_space<vmem>>, vector<2x32xf32>,
    } else {
    }
    %c0 = arith.constant 0 : index
    %c0_1 = arith.constant 0 : index
    %3 = vector.load %arg2[%c0, %c0_1] : memref<32x128xf32, #tpu.memory_space<vmem>>, vector<32x128xf32>
    %c0_2 = arith.constant 0 : index
    %c0_3 = arith.constant 0 : index
    %4 = vector.load %arg4[%c0_2, %c0_3] : memref<2x32xf32, #tpu.memory_space<vmem>>, vector<2x32xf32>
    %c0_4 = arith.constant 0 : index
    %c0_5 = arith.constant 0 : index
    %5 = vector.load %arg5[%c0_4, %c0_5] : memref<2x32xf32, #tpu.memory_space<vmem>>, vector<2x32xf32>
    %c0_i32_6 = arith.constant 0 : i32
    %6 = arith.index_cast %c0_i32_6 : i32 to index
    %c0_7 = arith.constant 0 : index
    %c0_8 = arith.constant 0 : index
    %7 = vector.load %arg1[%6, %c0_7, %c0_8] : memref<8x2x128xf32, #tpu.memory_space<vmem>>, vector<1x2x128xf32>
    %8 = vector.shape_cast %7 : vector<1x2x128xf32> to vector<2x128xf32>
    %cst = arith.constant dense<0.000000e+00> : vector<2x128xf32>
    %9 = tpu.matmul %4, %3, %cst {dimension_numbers = #tpu.dot_dimension_numbers<[1], [0], [0], [1], [0, 0, 1, 1], [], []>} : vector<2x32xf32>, vector<32x128xf32>, vector<2x128xf32> -> vector<2x128xf32>
    %10 = arith.addf %8, %9 : vector<2x128xf32>
    %11 = arith.negf %10 : vector<2x128xf32>
    %12 = math.exp %11 : vector<2x128xf32>
    %cst_9 = arith.constant 1.000000e+00 : f32
    %13 = vector.broadcast %cst_9 : f32 to vector<2x128xf32>
    %14 = arith.addf %13, %12 : vector<2x128xf32>
    %15 = arith.divf %13, %14 : vector<2x128xf32>
    %16 = math.tanh %10 : vector<2x128xf32>
    %17 = vector.extract_strided_slice %15 {offsets = [0, 0], sizes = [2, 32], strides = [1, 1]} : vector<2x128xf32> to vector<2x32xf32>
    %18 = vector.extract_strided_slice %15 {offsets = [0, 32], sizes = [2, 32], strides = [1, 1]} : vector<2x128xf32> to vector<2x32xf32>
    %19 = vector.extract_strided_slice %15 {offsets = [0, 96], sizes = [2, 32], strides = [1, 1]} : vector<2x128xf32> to vector<2x32xf32>
    %20 = vector.extract_strided_slice %16 {offsets = [0, 64], sizes = [2, 32], strides = [1, 1]} : vector<2x128xf32> to vector<2x32xf32>
    %21 = arith.mulf %18, %5 : vector<2x32xf32>
    %22 = arith.mulf %17, %20 : vector<2x32xf32>
    %23 = arith.addf %21, %22 : vector<2x32xf32>
    %24 = math.tanh %23 : vector<2x32xf32>
    %25 = arith.mulf %19, %24 : vector<2x32xf32>
    %26 = arith.index_cast %c0_i32_6 : i32 to index
    %c0_10 = arith.constant 0 : index
    %c0_11 = arith.constant 0 : index
    %27 = vector.load %arg3[%26, %c0_10, %c0_11] : memref<8x2x32xf32, #tpu.memory_space<vmem>>, vector<1x2x32xf32>
    %28 = vector.shape_cast %27 : vector<1x2x32xf32> to vector<2x32xf32>
    %29 = vector.shape_cast %25 : vector<2x32xf32> to vector<1x2x32xf32>
    tpu.vector_store %arg3[%26, %c0_10, %c0_11], %29 {strides = array<i32>} : memref<8x2x32xf32, #tpu.memory_space<vmem>>, vector<1x2x32xf32>,
    %c1_i32 = arith.constant 1 : i32
    %30 = arith.index_cast %c1_i32 : i32 to index
    %c0_12 = arith.constant 0 : index
    %c0_13 = arith.constant 0 : index
    %31 = vector.load %arg1[%30, %c0_12, %c0_13] : memref<8x2x128xf32, #tpu.memory_space<vmem>>, vector<1x2x128xf32>
    %32 = vector.shape_cast %31 : vector<1x2x128xf32> to vector<2x128xf32>
    %cst_14 = arith.constant dense<0.000000e+00> : vector<2x128xf32>
    %33 = tpu.matmul %25, %3, %cst_14 {dimension_numbers = #tpu.dot_dimension_numbers<[1], [0], [0], [1], [0, 0, 1, 1], [], []>} : vector<2x32xf32>, vector<32x128xf32>, vector<2x128xf32> -> vector<2x128xf32>
    %34 = arith.addf %32, %33 : vector<2x128xf32>
    %35 = arith.negf %34 : vector<2x128xf32>
    %36 = math.exp %35 : vector<2x128xf32>
    %cst_15 = arith.constant 1.000000e+00 : f32
    %37 = vector.broadcast %cst_15 : f32 to vector<2x128xf32>
    %38 = arith.addf %37, %36 : vector<2x128xf32>
    %39 = arith.divf %37, %38 : vector<2x128xf32>
    %40 = math.tanh %34 : vector<2x128xf32>
    %41 = vector.extract_strided_slice %39 {offsets = [0, 0], sizes = [2, 32], strides = [1, 1]} : vector<2x128xf32> to vector<2x32xf32>
    %42 = vector.extract_strided_slice %39 {offsets = [0, 32], sizes = [2, 32], strides = [1, 1]} : vector<2x128xf32> to vector<2x32xf32>
    %43 = vector.extract_strided_slice %39 {offsets = [0, 96], sizes = [2, 32], strides = [1, 1]} : vector<2x128xf32> to vector<2x32xf32>
    %44 = vector.extract_strided_slice %40 {offsets = [0, 64], sizes = [2, 32], strides = [1, 1]} : vector<2x128xf32> to vector<2x32xf32>
    %45 = arith.mulf %42, %23 : vector<2x32xf32>
    %46 = arith.mulf %41, %44 : vector<2x32xf32>
    %47 = arith.addf %45, %46 : vector<2x32xf32>
    %48 = math.tanh %47 : vector<2x32xf32>
    %49 = arith.mulf %43, %48 : vector<2x32xf32>
    %50 = arith.index_cast %c1_i32 : i32 to index
    %c0_16 = arith.constant 0 : index
    %c0_17 = arith.constant 0 : index
    %51 = vector.load %arg3[%50, %c0_16, %c0_17] : memref<8x2x32xf32, #tpu.memory_space<vmem>>, vector<1x2x32xf32>
    %52 = vector.shape_cast %51 : vector<1x2x32xf32> to vector<2x32xf32>
    %53 = vector.shape_cast %49 : vector<2x32xf32> to vector<1x2x32xf32>
    tpu.vector_store %arg3[%50, %c0_16, %c0_17], %53 {strides = array<i32>} : memref<8x2x32xf32, #tpu.memory_space<vmem>>, vector<1x2x32xf32>,
    %c2_i32 = arith.constant 2 : i32
    %54 = arith.index_cast %c2_i32 : i32 to index
    %c0_18 = arith.constant 0 : index
    %c0_19 = arith.constant 0 : index
    %55 = vector.load %arg1[%54, %c0_18, %c0_19] : memref<8x2x128xf32, #tpu.memory_space<vmem>>, vector<1x2x128xf32>
    %56 = vector.shape_cast %55 : vector<1x2x128xf32> to vector<2x128xf32>
    %cst_20 = arith.constant dense<0.000000e+00> : vector<2x128xf32>
    %57 = tpu.matmul %49, %3, %cst_20 {dimension_numbers = #tpu.dot_dimension_numbers<[1], [0], [0], [1], [0, 0, 1, 1], [], []>} : vector<2x32xf32>, vector<32x128xf32>, vector<2x128xf32> -> vector<2x128xf32>
    %58 = arith.addf %56, %57 : vector<2x128xf32>
    %59 = arith.negf %58 : vector<2x128xf32>
    %60 = math.exp %59 : vector<2x128xf32>
    %cst_21 = arith.constant 1.000000e+00 : f32
    %61 = vector.broadcast %cst_21 : f32 to vector<2x128xf32>
    %62 = arith.addf %61, %60 : vector<2x128xf32>
    %63 = arith.divf %61, %62 : vector<2x128xf32>
    %64 = math.tanh %58 : vector<2x128xf32>
    %65 = vector.extract_strided_slice %63 {offsets = [0, 0], sizes = [2, 32], strides = [1, 1]} : vector<2x128xf32> to vector<2x32xf32>
    %66 = vector.extract_strided_slice %63 {offsets = [0, 32], sizes = [2, 32], strides = [1, 1]} : vector<2x128xf32> to vector<2x32xf32>
    %67 = vector.extract_strided_slice %63 {offsets = [0, 96], sizes = [2, 32], strides = [1, 1]} : vector<2x128xf32> to vector<2x32xf32>
    %68 = vector.extract_strided_slice %64 {offsets = [0, 64], sizes = [2, 32], strides = [1, 1]} : vector<2x128xf32> to vector<2x32xf32>
    %69 = arith.mulf %66, %47 : vector<2x32xf32>
    %70 = arith.mulf %65, %68 : vector<2x32xf32>
    %71 = arith.addf %69, %70 : vector<2x32xf32>
    %72 = math.tanh %71 : vector<2x32xf32>
    %73 = arith.mulf %67, %72 : vector<2x32xf32>
    %74 = arith.index_cast %c2_i32 : i32 to index
    %c0_22 = arith.constant 0 : index
    %c0_23 = arith.constant 0 : index
    %75 = vector.load %arg3[%74, %c0_22, %c0_23] : memref<8x2x32xf32, #tpu.memory_space<vmem>>, vector<1x2x32xf32>
    %76 = vector.shape_cast %75 : vector<1x2x32xf32> to vector<2x32xf32>
    %77 = vector.shape_cast %73 : vector<2x32xf32> to vector<1x2x32xf32>
    tpu.vector_store %arg3[%74, %c0_22, %c0_23], %77 {strides = array<i32>} : memref<8x2x32xf32, #tpu.memory_space<vmem>>, vector<1x2x32xf32>,
    %c3_i32 = arith.constant 3 : i32
    %78 = arith.index_cast %c3_i32 : i32 to index
    %c0_24 = arith.constant 0 : index
    %c0_25 = arith.constant 0 : index
    %79 = vector.load %arg1[%78, %c0_24, %c0_25] : memref<8x2x128xf32, #tpu.memory_space<vmem>>, vector<1x2x128xf32>
    %80 = vector.shape_cast %79 : vector<1x2x128xf32> to vector<2x128xf32>
    %cst_26 = arith.constant dense<0.000000e+00> : vector<2x128xf32>
    %81 = tpu.matmul %73, %3, %cst_26 {dimension_numbers = #tpu.dot_dimension_numbers<[1], [0], [0], [1], [0, 0, 1, 1], [], []>} : vector<2x32xf32>, vector<32x128xf32>, vector<2x128xf32> -> vector<2x128xf32>
    %82 = arith.addf %80, %81 : vector<2x128xf32>
    %83 = arith.negf %82 : vector<2x128xf32>
    %84 = math.exp %83 : vector<2x128xf32>
    %cst_27 = arith.constant 1.000000e+00 : f32
    %85 = vector.broadcast %cst_27 : f32 to vector<2x128xf32>
    %86 = arith.addf %85, %84 : vector<2x128xf32>
    %87 = arith.divf %85, %86 : vector<2x128xf32>
    %88 = math.tanh %82 : vector<2x128xf32>
    %89 = vector.extract_strided_slice %87 {offsets = [0, 0], sizes = [2, 32], strides = [1, 1]} : vector<2x128xf32> to vector<2x32xf32>
    %90 = vector.extract_strided_slice %87 {offsets = [0, 32], sizes = [2, 32], strides = [1, 1]} : vector<2x128xf32> to vector<2x32xf32>
    %91 = vector.extract_strided_slice %87 {offsets = [0, 96], sizes = [2, 32], strides = [1, 1]} : vector<2x128xf32> to vector<2x32xf32>
    %92 = vector.extract_strided_slice %88 {offsets = [0, 64], sizes = [2, 32], strides = [1, 1]} : vector<2x128xf32> to vector<2x32xf32>
    %93 = arith.mulf %90, %71 : vector<2x32xf32>
    %94 = arith.mulf %89, %92 : vector<2x32xf32>
    %95 = arith.addf %93, %94 : vector<2x32xf32>
    %96 = math.tanh %95 : vector<2x32xf32>
    %97 = arith.mulf %91, %96 : vector<2x32xf32>
    %98 = arith.index_cast %c3_i32 : i32 to index
    %c0_28 = arith.constant 0 : index
    %c0_29 = arith.constant 0 : index
    %99 = vector.load %arg3[%98, %c0_28, %c0_29] : memref<8x2x32xf32, #tpu.memory_space<vmem>>, vector<1x2x32xf32>
    %100 = vector.shape_cast %99 : vector<1x2x32xf32> to vector<2x32xf32>
    %101 = vector.shape_cast %97 : vector<2x32xf32> to vector<1x2x32xf32>
    tpu.vector_store %arg3[%98, %c0_28, %c0_29], %101 {strides = array<i32>} : memref<8x2x32xf32, #tpu.memory_space<vmem>>, vector<1x2x32xf32>,
    %c4_i32 = arith.constant 4 : i32
    %102 = arith.index_cast %c4_i32 : i32 to index
    %c0_30 = arith.constant 0 : index
    %c0_31 = arith.constant 0 : index
    %103 = vector.load %arg1[%102, %c0_30, %c0_31] : memref<8x2x128xf32, #tpu.memory_space<vmem>>, vector<1x2x128xf32>
    %104 = vector.shape_cast %103 : vector<1x2x128xf32> to vector<2x128xf32>
    %cst_32 = arith.constant dense<0.000000e+00> : vector<2x128xf32>
    %105 = tpu.matmul %97, %3, %cst_32 {dimension_numbers = #tpu.dot_dimension_numbers<[1], [0], [0], [1], [0, 0, 1, 1], [], []>} : vector<2x32xf32>, vector<32x128xf32>, vector<2x128xf32> -> vector<2x128xf32>
    %106 = arith.addf %104, %105 : vector<2x128xf32>
    %107 = arith.negf %106 : vector<2x128xf32>
    %108 = math.exp %107 : vector<2x128xf32>
    %cst_33 = arith.constant 1.000000e+00 : f32
    %109 = vector.broadcast %cst_33 : f32 to vector<2x128xf32>
    %110 = arith.addf %109, %108 : vector<2x128xf32>
    %111 = arith.divf %109, %110 : vector<2x128xf32>
    %112 = math.tanh %106 : vector<2x128xf32>
    %113 = vector.extract_strided_slice %111 {offsets = [0, 0], sizes = [2, 32], strides = [1, 1]} : vector<2x128xf32> to vector<2x32xf32>
    %114 = vector.extract_strided_slice %111 {offsets = [0, 32], sizes = [2, 32], strides = [1, 1]} : vector<2x128xf32> to vector<2x32xf32>
    %115 = vector.extract_strided_slice %111 {offsets = [0, 96], sizes = [2, 32], strides = [1, 1]} : vector<2x128xf32> to vector<2x32xf32>
    %116 = vector.extract_strided_slice %112 {offsets = [0, 64], sizes = [2, 32], strides = [1, 1]} : vector<2x128xf32> to vector<2x32xf32>
    %117 = arith.mulf %114, %95 : vector<2x32xf32>
    %118 = arith.mulf %113, %116 : vector<2x32xf32>
    %119 = arith.addf %117, %118 : vector<2x32xf32>
    %120 = math.tanh %119 : vector<2x32xf32>
    %121 = arith.mulf %115, %120 : vector<2x32xf32>
    %122 = arith.index_cast %c4_i32 : i32 to index
    %c0_34 = arith.constant 0 : index
    %c0_35 = arith.constant 0 : index
    %123 = vector.load %arg3[%122, %c0_34, %c0_35] : memref<8x2x32xf32, #tpu.memory_space<vmem>>, vector<1x2x32xf32>
    %124 = vector.shape_cast %123 : vector<1x2x32xf32> to vector<2x32xf32>
    %125 = vector.shape_cast %121 : vector<2x32xf32> to vector<1x2x32xf32>
    tpu.vector_store %arg3[%122, %c0_34, %c0_35], %125 {strides = array<i32>} : memref<8x2x32xf32, #tpu.memory_space<vmem>>, vector<1x2x32xf32>,
    %c5_i32 = arith.constant 5 : i32
    %126 = arith.index_cast %c5_i32 : i32 to index
    %c0_36 = arith.constant 0 : index
    %c0_37 = arith.constant 0 : index
    %127 = vector.load %arg1[%126, %c0_36, %c0_37] : memref<8x2x128xf32, #tpu.memory_space<vmem>>, vector<1x2x128xf32>
    %128 = vector.shape_cast %127 : vector<1x2x128xf32> to vector<2x128xf32>
    %cst_38 = arith.constant dense<0.000000e+00> : vector<2x128xf32>
    %129 = tpu.matmul %121, %3, %cst_38 {dimension_numbers = #tpu.dot_dimension_numbers<[1], [0], [0], [1], [0, 0, 1, 1], [], []>} : vector<2x32xf32>, vector<32x128xf32>, vector<2x128xf32> -> vector<2x128xf32>
    %130 = arith.addf %128, %129 : vector<2x128xf32>
    %131 = arith.negf %130 : vector<2x128xf32>
    %132 = math.exp %131 : vector<2x128xf32>
    %cst_39 = arith.constant 1.000000e+00 : f32
    %133 = vector.broadcast %cst_39 : f32 to vector<2x128xf32>
    %134 = arith.addf %133, %132 : vector<2x128xf32>
    %135 = arith.divf %133, %134 : vector<2x128xf32>
    %136 = math.tanh %130 : vector<2x128xf32>
    %137 = vector.extract_strided_slice %135 {offsets = [0, 0], sizes = [2, 32], strides = [1, 1]} : vector<2x128xf32> to vector<2x32xf32>
    %138 = vector.extract_strided_slice %135 {offsets = [0, 32], sizes = [2, 32], strides = [1, 1]} : vector<2x128xf32> to vector<2x32xf32>
    %139 = vector.extract_strided_slice %135 {offsets = [0, 96], sizes = [2, 32], strides = [1, 1]} : vector<2x128xf32> to vector<2x32xf32>
    %140 = vector.extract_strided_slice %136 {offsets = [0, 64], sizes = [2, 32], strides = [1, 1]} : vector<2x128xf32> to vector<2x32xf32>
    %141 = arith.mulf %138, %119 : vector<2x32xf32>
    %142 = arith.mulf %137, %140 : vector<2x32xf32>
    %143 = arith.addf %141, %142 : vector<2x32xf32>
    %144 = math.tanh %143 : vector<2x32xf32>
    %145 = arith.mulf %139, %144 : vector<2x32xf32>
    %146 = arith.index_cast %c5_i32 : i32 to index
    %c0_40 = arith.constant 0 : index
    %c0_41 = arith.constant 0 : index
    %147 = vector.load %arg3[%146, %c0_40, %c0_41] : memref<8x2x32xf32, #tpu.memory_space<vmem>>, vector<1x2x32xf32>
    %148 = vector.shape_cast %147 : vector<1x2x32xf32> to vector<2x32xf32>
    %149 = vector.shape_cast %145 : vector<2x32xf32> to vector<1x2x32xf32>
    tpu.vector_store %arg3[%146, %c0_40, %c0_41], %149 {strides = array<i32>} : memref<8x2x32xf32, #tpu.memory_space<vmem>>, vector<1x2x32xf32>,
    %c6_i32 = arith.constant 6 : i32
    %150 = arith.index_cast %c6_i32 : i32 to index
    %c0_42 = arith.constant 0 : index
    %c0_43 = arith.constant 0 : index
    %151 = vector.load %arg1[%150, %c0_42, %c0_43] : memref<8x2x128xf32, #tpu.memory_space<vmem>>, vector<1x2x128xf32>
    %152 = vector.shape_cast %151 : vector<1x2x128xf32> to vector<2x128xf32>
    %cst_44 = arith.constant dense<0.000000e+00> : vector<2x128xf32>
    %153 = tpu.matmul %145, %3, %cst_44 {dimension_numbers = #tpu.dot_dimension_numbers<[1], [0], [0], [1], [0, 0, 1, 1], [], []>} : vector<2x32xf32>, vector<32x128xf32>, vector<2x128xf32> -> vector<2x128xf32>
    %154 = arith.addf %152, %153 : vector<2x128xf32>
    %155 = arith.negf %154 : vector<2x128xf32>
    %156 = math.exp %155 : vector<2x128xf32>
    %cst_45 = arith.constant 1.000000e+00 : f32
    %157 = vector.broadcast %cst_45 : f32 to vector<2x128xf32>
    %158 = arith.addf %157, %156 : vector<2x128xf32>
    %159 = arith.divf %157, %158 : vector<2x128xf32>
    %160 = math.tanh %154 : vector<2x128xf32>
    %161 = vector.extract_strided_slice %159 {offsets = [0, 0], sizes = [2, 32], strides = [1, 1]} : vector<2x128xf32> to vector<2x32xf32>
    %162 = vector.extract_strided_slice %159 {offsets = [0, 32], sizes = [2, 32], strides = [1, 1]} : vector<2x128xf32> to vector<2x32xf32>
    %163 = vector.extract_strided_slice %159 {offsets = [0, 96], sizes = [2, 32], strides = [1, 1]} : vector<2x128xf32> to vector<2x32xf32>
    %164 = vector.extract_strided_slice %160 {offsets = [0, 64], sizes = [2, 32], strides = [1, 1]} : vector<2x128xf32> to vector<2x32xf32>
    %165 = arith.mulf %162, %143 : vector<2x32xf32>
    %166 = arith.mulf %161, %164 : vector<2x32xf32>
    %167 = arith.addf %165, %166 : vector<2x32xf32>
    %168 = math.tanh %167 : vector<2x32xf32>
    %169 = arith.mulf %163, %168 : vector<2x32xf32>
    %170 = arith.index_cast %c6_i32 : i32 to index
    %c0_46 = arith.constant 0 : index
    %c0_47 = arith.constant 0 : index
    %171 = vector.load %arg3[%170, %c0_46, %c0_47] : memref<8x2x32xf32, #tpu.memory_space<vmem>>, vector<1x2x32xf32>
    %172 = vector.shape_cast %171 : vector<1x2x32xf32> to vector<2x32xf32>
    %173 = vector.shape_cast %169 : vector<2x32xf32> to vector<1x2x32xf32>
    tpu.vector_store %arg3[%170, %c0_46, %c0_47], %173 {strides = array<i32>} : memref<8x2x32xf32, #tpu.memory_space<vmem>>, vector<1x2x32xf32>,
    %c7_i32 = arith.constant 7 : i32
    %174 = arith.index_cast %c7_i32 : i32 to index
    %c0_48 = arith.constant 0 : index
    %c0_49 = arith.constant 0 : index
    %175 = vector.load %arg1[%174, %c0_48, %c0_49] : memref<8x2x128xf32, #tpu.memory_space<vmem>>, vector<1x2x128xf32>
    %176 = vector.shape_cast %175 : vector<1x2x128xf32> to vector<2x128xf32>
    %cst_50 = arith.constant dense<0.000000e+00> : vector<2x128xf32>
    %177 = tpu.matmul %169, %3, %cst_50 {dimension_numbers = #tpu.dot_dimension_numbers<[1], [0], [0], [1], [0, 0, 1, 1], [], []>} : vector<2x32xf32>, vector<32x128xf32>, vector<2x128xf32> -> vector<2x128xf32>
    %178 = arith.addf %176, %177 : vector<2x128xf32>
    %179 = arith.negf %178 : vector<2x128xf32>
    %180 = math.exp %179 : vector<2x128xf32>
    %cst_51 = arith.constant 1.000000e+00 : f32
    %181 = vector.broadcast %cst_51 : f32 to vector<2x128xf32>
    %182 = arith.addf %181, %180 : vector<2x128xf32>
    %183 = arith.divf %181, %182 : vector<2x128xf32>
    %184 = math.tanh %178 : vector<2x128xf32>
    %185 = vector.extract_strided_slice %183 {offsets = [0, 0], sizes = [2, 32], strides = [1, 1]} : vector<2x128xf32> to vector<2x32xf32>
    %186 = vector.extract_strided_slice %183 {offsets = [0, 32], sizes = [2, 32], strides = [1, 1]} : vector<2x128xf32> to vector<2x32xf32>
    %187 = vector.extract_strided_slice %183 {offsets = [0, 96], sizes = [2, 32], strides = [1, 1]} : vector<2x128xf32> to vector<2x32xf32>
    %188 = vector.extract_strided_slice %184 {offsets = [0, 64], sizes = [2, 32], strides = [1, 1]} : vector<2x128xf32> to vector<2x32xf32>
    %189 = arith.mulf %186, %167 : vector<2x32xf32>
    %190 = arith.mulf %185, %188 : vector<2x32xf32>
    %191 = arith.addf %189, %190 : vector<2x32xf32>
    %192 = math.tanh %191 : vector<2x32xf32>
    %193 = arith.mulf %187, %192 : vector<2x32xf32>
    %194 = arith.index_cast %c7_i32 : i32 to index
    %c0_52 = arith.constant 0 : index
    %c0_53 = arith.constant 0 : index
    %195 = vector.load %arg3[%194, %c0_52, %c0_53] : memref<8x2x32xf32, #tpu.memory_space<vmem>>, vector<1x2x32xf32>
    %196 = vector.shape_cast %195 : vector<1x2x32xf32> to vector<2x32xf32>
    %197 = vector.shape_cast %193 : vector<2x32xf32> to vector<1x2x32xf32>
    tpu.vector_store %arg3[%194, %c0_52, %c0_53], %197 {strides = array<i32>} : memref<8x2x32xf32, #tpu.memory_space<vmem>>, vector<1x2x32xf32>,
    %c8_i32 = arith.constant 8 : i32
    %c0_54 = arith.constant 0 : index
    %c0_55 = arith.constant 0 : index
    %198 = vector.load %arg4[%c0_54, %c0_55] : memref<2x32xf32, #tpu.memory_space<vmem>>, vector<2x32xf32>
    tpu.vector_store %arg4[%c0_54, %c0_55], %193 {strides = array<i32>} : memref<2x32xf32, #tpu.memory_space<vmem>>, vector<2x32xf32>,
    %c0_56 = arith.constant 0 : index
    %c0_57 = arith.constant 0 : index
    %199 = vector.load %arg5[%c0_56, %c0_57] : memref<2x32xf32, #tpu.memory_space<vmem>>, vector<2x32xf32>
    tpu.vector_store %arg5[%c0_56, %c0_57], %191 {strides = array<i32>} : memref<2x32xf32, #tpu.memory_space<vmem>>, vector<2x32xf32>,
    return
  }
  func.func @transform_0(%arg0: i32) -> (i32, i32, i32) {
    %c0_i32 = arith.constant 0 : i32
    %c0_i32_0 = arith.constant 0 : i32
    %c0_i32_1 = arith.constant 0 : i32
    return %arg0, %c0_i32, %c0_i32_0 : i32, i32, i32
  }
  func.func @transform_1(%arg0: i32) -> (i32, i32) {
    %c0_i32 = arith.constant 0 : i32
    %c0_i32_0 = arith.constant 0 : i32
    %c0_i32_1 = arith.constant 0 : i32
    return %c0_i32, %c0_i32_0 : i32, i32
  }
  func.func @transform_2(%arg0: i32) -> (i32, i32, i32) {
    %c0_i32 = arith.constant 0 : i32
    %c0_i32_0 = arith.constant 0 : i32
    %c0_i32_1 = arith.constant 0 : i32
    return %arg0, %c0_i32, %c0_i32_0 : i32, i32, i32
  }
}

</mosaic_0001>

<bundles_post_ra>
// kernel: spectrum_denoise_forward.3
= control target key start
LH: loop header
LB: loop body
LE: loop exit
PB: predicated region body
PF: predicated region fallthrough
CT: control target
= control target key end

     0   :  { %s796_s18 = smov 0   ;;  %s890_s0 = inlined_call_operand.vmem [shape: f32[64,64], index: 0, kind: input, shape index: {}]   ;;  %s891_s1 = inlined_call_operand.vmem [shape: f32[64,128], index: 1, kind: input, shape index: {}]   ;;  %s892_s2 = inlined_call_operand.vmem [shape: f32[64,128], index: 2, kind: input, shape index: {}]   ;;  %s893_s3 = inlined_call_operand.vmem [shape: f32[1,128], index: 3, kind: input, shape index: {}]   ;;  %s894_s4 = inlined_call_operand.vmem [shape: f32[64,64], index: 4, kind: output, shape index: {0}]   ;;  %s895_s5 = inlined_call_operand.vmem [shape: f32[64,128], index: 5, kind: output, shape index: {1}]  }
   0x1 LB: > { %s618_s19 = sadd.s32 4294967295, %s763_s18   ;;  %p622_p0 = scmp.ge.s32.totalorder %s763_s18, 1  ;;  %s763_s18 = sphi %s796_s18, %s16_s18  }
   0x2   : > { %p191_p1 = scmp.lt.s32.totalorder %s763_s18, 3 }
   0x4   : > { %p192_p2 = pnand %p622_p0, %p191_p1 }
   0x5   : > { %v246_v0 = vld [vmem:[%s891_s1] sm:$0xff] (!%p192_p2)  ;;  %v247_v1 = vld [vmem:[%s891_s1 + $0x8] sm:$0xff] (!%p192_p2)  ;;  %v248_v2 = vld [vmem:[%s891_s1 + $0x10] sm:$0xff] (!%p192_p2)  ;;  %s623_s26 = sshll.u32 (!%p192_p2), %s618_s19, 2  ;;  %vm254_vm0 = vcmask (!%p192_p2), 523264   ;;  %s765_s6 = smov (!%p192_p2), 64  }
   0x6   : > { %195 = sbr.rel (%p192_p2) target bundleno = 597 (0x255), region = 36  ;;  %v708_v3 = vpack.c.bf16 (!%p192_p2), %v247_v1, %v246_v0  ;;  %v249_v4 = vld [vmem:[%s891_s1 + $0x18] sm:$0xff] (!%p192_p2)  ;;  %p225_p3 = scmp.lt.s32.totalorder (!%p192_p2), %s623_s26, 7  ;;  %v250_v6 = vld [vmem:[%s891_s1 + $0x20] sm:$0xff] (!%p192_p2)  ;;  %v251_v7 = vld [vmem:[%s891_s1 + $0x28] sm:$0xff] (!%p192_p2) }
   0x7   : > { %v712_v5 = vpack.c.bf16 (!%p192_p2), %v249_v4, %v248_v2  ;;  %v716_v8 = vpack.c.bf16 (!%p192_p2), %v251_v7, %v250_v6  ;;  %v252_v9 = vld [vmem:[%s891_s1 + $0x30] sm:$0xff] (!%p192_p2)  ;;  %v253_v10 = vld [vmem:[%s891_s1 + $0x38] sm:$0xff] (!%p192_p2)  ;;  %v412_v16 = vld [vmem:[%s892_s2] sm:$0xff] (!%p192_p2) }
   0x8   : > { %709 = vmatprep.subr.bf16.mxu0 (!%p192_p2), %v708_v3  ;;  %v720_v12 = vpack.c.bf16 (!%p192_p2), %v253_v10, %v252_v9  ;;  %v413_v17 = vld [vmem:[%s892_s2 + $0x8] sm:$0xff] (!%p192_p2)  ;;  %v414_v20 = vld [vmem:[%s892_s2 + $0x10] sm:$0xff] (!%p192_p2)  ;;  %v415_v21 = vld [vmem:[%s892_s2 + $0x18] sm:$0xff] (!%p192_p2) }
   0x9   : > { %711 = vmatpush3.bf16.msra.mxu0 (!%p192_p2), %v708_v3  ;;  %v724_v18 = vpack.c.bf16 (!%p192_p2), %v413_v17, %v412_v16  ;;  %v728_v23 = vpack.c.bf16 (!%p192_p2), %v415_v21, %v414_v20  ;;  %v416_v25 = vld [vmem:[%s892_s2 + $0x20] sm:$0xff] (!%p192_p2)  ;;  %v417_v26 = vld [vmem:[%s892_s2 + $0x28] sm:$0xff] (!%p192_p2)  ;;  %v418_v27 = vld [vmem:[%s892_s2 + $0x30] sm:$0xff] (!%p192_p2) }
   0xa   : > { %713 = vmatprep.subr.bf16.mxu0 (!%p192_p2), %v712_v5  ;;  %v732_v29 = vpack.c.bf16 (!%p192_p2), %v417_v26, %v416_v25  ;;  %v419_v30 = vld [vmem:[%s892_s2 + $0x38] sm:$0xff] (!%p192_p2)  ;;  %v633_v4 = vld [vmem:[%s893_s3] ss:$0 sm:$0xff] (!%p192_p2) }
   0xb   : > { %725 = vmatprep.subr.bf16.mxu1 (!%p192_p2), %v724_v18  ;;  %v736_v34 = vpack.c.bf16 (!%p192_p2), %v419_v30, %v418_v27 }
   0xc   : > { %727 = vmatpush3.bf16.msra.mxu1 (!%p192_p2), %v724_v18 }
   0xd   : > { %s897_s26 = smov (!%p225_p3, %s623_s26), 7  ;;  %715 = vmatpush3.bf16.msra.mxu0 %v712_v5  ;;  %729 = vmatprep.subr.bf16.mxu1 %v728_v23 }
   0xe   : > { %s822_s8 = sshll.u32 %s897_s26, 3  ;;  %717 = vmatprep.subr.bf16.mxu0 %v716_v8 }
   0xf   : > { %s228_s15 = scalar_lea.vmem %s890_s0, %s822_s8  ;;  %s866_s12 = scalar_lea.vmem %s894_s4, %s822_s8 }
  0x10   : > { %v242_v11 = vld [vmem:[%s228_s15] sm:$0xff]  ;;  %v243_v13 = vld [vmem:[%s228_s15 + $0x8] sm:$0xff]  ;;  %v244_v14 = vld [vmem:[%s228_s15 + $0x10] sm:$0xff]  ;;  %731 = vmatpush3.bf16.msra.mxu1 %v728_v23  ;;  %s240_s17 = scalar_lea.vmem %s895_s5, %s822_s8 }
  0x11   : > { %680 = vmatprep.mubr.msk.f32.mxu0 %vm254_vm0, %v242_v11  ;;  %719 = vmatpush3.bf16.msra.mxu0 %v716_v8  ;;  %v245_v15 = vld [vmem:[%s228_s15 + $0x18] sm:$0xff] }
  0x12   : > { %721 = vmatprep.subr.bf16.mxu0 %v720_v12  ;;  %733 = vmatprep.subr.bf16.mxu1 %v732_v29 }
  0x14   : > { %735 = vmatpush3.bf16.msra.mxu1 %v732_v29 }
  0x15   : > { %723 = vmatpush3.bf16.msra.mxu0 %v720_v12  ;;  %737 = vmatprep.subr.bf16.mxu1 %v736_v34 }
  0x18   : > { %681 = vmatmul.mubr.msk.f32.vlgmr.msra.gmra.mrb[0].mxu0 %vm254_vm0, %v243_v13  ;;  %739 = vmatpush3.bf16.msra.mxu1 %v736_v34 }
  0x19   : > { %683 = vmatprep.mubr.msk.f32.mxu0 %vm254_vm0, %v244_v14 }
  0x1c   : > { %684 = vmatmul.mubr.msk.f32.gmra.mrb[2].mxu0 %vm254_vm0, %v245_v15 }
  0xeb   : > { %v682_v19 = vpop.f32.mrb[0].mxu0 }
  0xec   : > { %v333_v22 = vpop.f32.mrb[1].mxu0  ;;  %v353_v32 = vmul.f32 %v682_v19, %v682_v19 }
  0xed   : > { %v352_v24 = vmul.f32 %v333_v22, %v333_v22 }
  0xef   : > { %360 = vrot.lane.b32.xlu0 %v352_v24, %s765_s6  ;;  %v685_v28 = vpop.f32.mrb[2].mxu0 }
  0xf0   : > { %v343_v31 = vpop.f32.mrb[3].mxu0  ;;  %v355_v35 = vmul.f32 %v685_v28, %v685_v28 }
  0xf1   : > { %v354_v33 = vmul.f32 %v343_v31, %v343_v31 }
  0xf3   : > { %362 = vrot.lane.b32.xlu0 %v353_v32, %s765_s6  ;;  %364 = vrot.lane.b32.xlu1 %v354_v33, %s765_s6 }
  0xf7   : > { %366 = vrot.lane.b32.xlu1 %v355_v35, %s765_s6 }
 0x161   : > { %v361_v36 = vpop.permute.xlu0 %360 }
 0x162   : > { %v372_v37 = vadd.f32 %v361_v36, %v352_v24 }
 0x164   : > { %v376_v38 = vadd.f32 1e-12, %v372_v37 }
 0x165   : > { %v363_v39 = vpop.permute.xlu0 %362  ;;  %v365_v40 = vpop.permute.xlu1 %364 }
 0x166   : > { %v373_v41 = vadd.f32 %v363_v39, %v353_v32  ;;  %v374_v42 = vadd.f32 %v365_v40, %v354_v33  ;;  %749 = vrsqrt.f32 %v376_v38  ;;  %vm382_vm1 = vcmp.eq.f32.partialorder %v376_v38, inf }
 0x167   : > { %v385_v50 = vand.u32 2147483648, %v376_v38  ;;  %vm384_vm2 = vcmp.eq.f32.partialorder %v376_v38, 0.0 }
 0x168   : > { %v377_v43 = vadd.f32 1e-12, %v373_v41  ;;  %v378_v44 = vadd.f32 1e-12, %v374_v42 }
 0x169   : > { %v367_v45 = vpop.permute.xlu1 %366 }
 0x16a   : > { %751 = vrsqrt.f32 %v377_v43  ;;  %v375_v46 = vadd.f32 %v367_v45, %v355_v35  ;;  %vm389_vm3 = vcmp.eq.f32.partialorder %v377_v43, inf  ;;  %v392_v56 = vand.u32 2147483648, %v377_v43 }
 0x16b   : > { %753 = vrsqrt.f32 %v378_v44  ;;  %vm391_vm4 = vcmp.eq.f32.partialorder %v377_v43, 0.0  ;;  %vm396_vm5 = vcmp.eq.f32.partialorder %v378_v44, inf  ;;  %v399_v59 = vand.u32 2147483648, %v378_v44 }
 0x16c   : > { %v379_v47 = vadd.f32 1e-12, %v375_v46  ;;  %vm398_vm6 = vcmp.eq.f32.partialorder %v378_v44, 0.0 }
 0x16e   : > { %755 = vrsqrt.f32 %v379_v47  ;;  %vm403_vm7 = vcmp.eq.f32.partialorder %v379_v47, inf  ;;  %v406_v1 = vand.u32 2147483648, %v379_v47  ;;  %vm405_vm8 = vcmp.eq.f32.partialorder %v379_v47, 0.0 }
 0x170   : > { %v750_v48 = vpop.eup %749 }
 0x171   : > { %v381_v49 = vmul.f32 %v750_v48, %v376_v38 }
 0x173   : > { %v383_v51 = vsel %vm382_vm1, %v376_v38, %v381_v49 }
 0x174   : > { %v752_v52 = vpop.eup %751  ;;  %v386_v53 = vsel %vm384_vm2, %v385_v50, %v383_v51 }
 0x175   : > { %v754_v54 = vpop.eup %753  ;;  %408 = vst.msk [vmem:[%s866_s12] sm:$0xff] %vm254_vm0, %v386_v53  ;;  %702 = vmatprep.mubr.msk.f32.mxu1 %vm254_vm0, %v386_v53  ;;  %v388_v55 = vmul.f32 %v752_v52, %v377_v43 }
 0x176   : > { %v395_v57 = vmul.f32 %v754_v54, %v378_v44 }
 0x177   : > { %v390_v58 = vsel %vm389_vm3, %v377_v43, %v388_v55 }
 0x178   : > { %v756_v60 = vpop.eup %755  ;;  %v393_v61 = vsel %vm391_vm4, %v392_v56, %v390_v58  ;;  %v397_v62 = vsel %vm396_vm5, %v378_v44, %v395_v57 }
 0x179   : > { %409 = vst.msk [vmem:[%s866_s12 + $0x8] sm:$0xff] %vm254_vm0, %v393_v61  ;;  %703 = vmatmul.mubr.msk.f32.vlgmr.msra.gmra.mrb[0].mxu1 %vm254_vm0, %v393_v61  ;;  %v400_v63 = vsel %vm398_vm6, %v399_v59, %v397_v62  ;;  %v402_v0 = vmul.f32 %v756_v60, %v379_v47 }
 0x17a   : > { %410 = vst.msk [vmem:[%s866_s12 + $0x10] sm:$0xff] %vm254_vm0, %v400_v63  ;;  %705 = vmatprep.mubr.msk.f32.mxu1 %vm254_vm0, %v400_v63 }
 0x17b   : > { %v404_v2 = vsel %vm403_vm7, %v379_v47, %v402_v0 }
 0x17c   : > { %v407_v3 = vsel %vm405_vm8, %v406_v1, %v404_v2 }
 0x17d   : > { %411 = vst.msk [vmem:[%s866_s12 + $0x18] sm:$0xff] %vm254_vm0, %v407_v3  ;;  %706 = vmatmul.mubr.msk.f32.gmra.mrb[2].mxu1 %vm254_vm0, %v407_v3 }
 0x24c   : > { %v704_v5 = vpop.f32.mrb[0].mxu1 }
 0x24d   : > { %v505_v6 = vpop.f32.mrb[1].mxu1  ;;  %v511_v8 = vadd.f32 %v704_v5, %v633_v4 }
 0x24e   : > { %v506_v7 = vadd.f32 %v633_v4, %v505_v6 }
 0x24f   : > { %525 = vst [vmem:[%s240_s17 + $0x8] sm:$0xff] %v511_v8 }
 0x250   : > { %524 = vst [vmem:[%s240_s17] sm:$0xff] %v506_v7  ;;  %v707_v9 = vpop.f32.mrb[2].mxu1 }
 0x251   : > { %v515_v10 = vpop.f32.mrb[3].mxu1  ;;  %v521_v12 = vadd.f32 %v707_v9, %v633_v4 }
 0x252   : > { %v516_v11 = vadd.f32 %v633_v4, %v515_v10 }
 0x253   : > { %527 = vst [vmem:[%s240_s17 + $0x18] sm:$0xff] %v521_v12 }
 0x254   : > { %526 = vst [vmem:[%s240_s17 + $0x10] sm:$0xff] %v516_v11 }
 0x255 PF: > { %s16_s18 = sadd.s32 1, %s763_s18  }
 0x256   : > { %p13_p4 = scmp.ge.s32.totalorder %s16_s18, 4  }
 0x258   :  { %15 = sbr.rel (!%p13_p4) target bundleno = 1 (0x1), region = 78 }

// kernel: spectrum_denoise_forward.5
= control target key start
LH: loop header
LB: loop body
LE: loop exit
PB: predicated region body
PF: predicated region fallthrough
CT: control target
= control target key end

     0   :  { %10 = vsyncpa [#allocation3], 0  ;;  %s593_s18 = smov 0   ;;  %s645_s0 = inlined_call_operand.vmem [shape: f32[32,32], index: 0, kind: input, shape index: {}]   ;;  %s646_s1 = inlined_call_operand.vmem [shape: f32[32,64], index: 1, kind: input, shape index: {}]   ;;  %s647_s2 = inlined_call_operand.vmem [shape: f32[1,64], index: 2, kind: input, shape index: {}]   ;;  %s648_s3 = inlined_call_operand.vmem [shape: f32[32,64], index: 3, kind: input, shape index: {}]   ;;  %s649_s4 = inlined_call_operand.vmem [shape: f32[32,1], index: 4, kind: input, shape index: {}]   ;;  %s650_s5 = inlined_call_operand.hbm [shape: f32[1], index: 5, kind: output, shape index: {}]  }
   0x1 LB: > { %s599_s19 = sadd.s32 4294967295, %s558_s18   ;;  %p473_p0 = scmp.ge.s32.totalorder %s558_s18, 1  ;;  %s558_s18 = sphi %s593_s18, %s16_s18  }
   0x2   : > { %p206_p1 = scmp.lt.s32.totalorder %s558_s18, 3 }
   0x4   : > { %p207_p2 = pnand %p473_p0, %p206_p1 }
   0x5   : > { %v265_v0 = vld [vmem:[%s646_s1] sm:$0xff] (!%p207_p2)  ;;  %v266_v1 = vld [vmem:[%s646_s1 + $0x8] sm:$0xff] (!%p207_p2)  ;;  %v267_v2 = vld [vmem:[%s646_s1 + $0x10] sm:$0xff] (!%p207_p2)  ;;  %s474_s26 = sshll.u32 (!%p207_p2), %s599_s19, 1  ;;  %v560_v6 = vmov (!%p207_p2), 0   ;;  %vm276_vm0 = vcmask (!%p207_p2), 261120   ;;  %v376_v11 = vlaneseq (!%p207_p2) }
   0x6   : > { %210 = sbr.rel (%p207_p2) target bundleno = 458 (0x1ca), region = 40  ;;  %v505_v3 = vpack.c.bf16 (!%p207_p2), %v266_v1, %v265_v0  ;;  %v268_v4 = vld [vmem:[%s646_s1 + $0x18] sm:$0xff] (!%p207_p2)  ;;  %p240_p3 = scmp.lt.s32.totalorder (!%p207_p2), %s474_s26, 3  ;;  %535 = vset.pattern.permute.xlu0 (!%p207_p2), %v560_v6  ;;  %v481_v13 = vld [vmem:[%s647_s2] ss:$0 sm:$0xff] (!%p207_p2)  ;;  %vm384_vm2 = vcmask (!%p207_p2), 523264  }
   0x7   : > { %v509_v5 = vpack.c.bf16 (!%p207_p2), %v268_v4, %v267_v2  ;;  %v377_v15 = vand.u32 (!%p207_p2), 127, %v376_v11  ;;  %p521_p4 = scmp.eq.s32.totalorder (!%p207_p2), %s599_s19, 0  ;;  %s561_s16 = smov (!%p207_p2), 0.0  }
   0x8   : > { %506 = vmatprep.subr.bf16.mxu0 (!%p207_p2), %v505_v3  ;;  %p522_p5 = scmp.eq.s32.totalorder (!%p207_p2), %s599_s19, 1  ;;  %s536_s25 = scalar_lea.hbm (!%p207_p2), %s650_s5, 16 }
   0x9   : > { %508 = vmatpush3.bf16.msra.mxu0 (!%p207_p2), %v505_v3  ;;  %vm378_vm1 = vcmp.lt.s32.totalorder (!%p207_p2), %v377_v15, 33  ;;  %p537_p6 = scmp.ne.s32.totalorder (!%p207_p2), %s650_s5, %s536_s25  ;;  %p542_p9 = scmp.lt.u32.totalorder (!%p207_p2), %s536_s25, %s650_s5 }
   0xa   : > { %510 = vmatprep.subr.bf16.mxu0 (!%p207_p2), %v509_v5 }
   0xb   : > { %p538_p7 = pnand (!%p207_p2), %p537_p6, %p522_p5 }
   0xd   : > { %s652_s26 = smov (!%p240_p3, %s474_s26), 3  ;;  %512 = vmatpush3.bf16.msra.mxu0 %v509_v5  ;;  %516 = sst [smem:[#allocation2]] (%p521_p4), %s561_s16 }
   0xe   : > { %s475_s29 = sshll.u32 %s652_s26, 3  ;;  %s381_s17 = sld [smem:[#allocation2]] }
   0xf   : > { %s243_s7 = scalar_lea.vmem %s645_s0, %s475_s29  ;;  %s255_s10 = scalar_lea.vmem %s649_s4, %s475_s29 }
  0x10   : > { %v263_v7 = vld [vmem:[%s243_s7] sm:$0xff]  ;;  %v264_v9 = vld [vmem:[%s243_s7 + $0x8] sm:$0xff]  ;;  %s249_s13 = scalar_lea.vmem %s648_s3, %s475_s29  ;;  %p539_p8 = pneg %p538_p7 }
  0x11   : > { %v362_v8 = vld [vmem:[%s255_s10] sm:$0xff]  ;;  %502 = vmatprep.mubr.msk.f32.mxu0 %vm276_vm0, %v263_v7  ;;  %v363_v10 = vld [vmem:[%s255_s10 + $0x8] sm:$0xff] }
  0x12   : > { %366 = vperm.xlu0 %535, %v362_v8   ;;  %503 = vmatmul.mubr.msk.f32.vlgmr.msra.gmra.mrb[0].mxu0 %vm276_vm0, %v264_v9  ;;  %v359_v16 = vld [vmem:[%s249_s13 + $0x8] sm:$0xff]  ;;  %v358_v19 = vld [vmem:[%s249_s13] sm:$0xff]  ;;  %p544_p10 = pnand %p542_p9, %p539_p8 }
  0x16   : > { %371 = vperm.xlu0 %535, %v363_v10  }
  0x91   : > { %v367_v12 = vpop.permute.xlu0 %366 }
  0x95   : > { %v372_v22 = vpop.permute.xlu0 %371 }
  0xe5   : > { %v504_v14 = vpop.f32.mrb[0].mxu0 }
  0xe6   : > { %v355_v17 = vadd.f32 %v504_v14, %v481_v13  ;;  %v349_v18 = vpop.f32.mrb[1].mxu0 }
  0xe7   : > { %v350_v20 = vadd.f32 %v481_v13, %v349_v18 }
  0xe8   : > { %v361_v21 = vsub.f32 %v355_v17, %v359_v16 }
  0xe9   : > { %v360_v23 = vsub.f32 %v350_v20, %v358_v19 }
  0xea   : > { %v375_v24 = vmul.f32 %v372_v22, %v361_v21 }
  0xeb   : > { %v374_v25 = vmul.f32 %v367_v12, %v360_v23 }
  0xec   : > { %v380_v26 = vsel %vm378_vm1, %v375_v24, 0.0 }
  0xed   : > { %v383_v27 = vmul.f32 %v380_v26, %v380_v26  ;;  %v379_v28 = vsel %vm378_vm1, %v374_v25, 0.0 }
  0xee   : > { %v382_v29 = vmul.f32 %v379_v28, %v379_v28 }
  0xef   : > { %v386_v30 = vsel %vm384_vm2, %v383_v27, 0.0 }
  0xf0   : > { %v385_v31 = vsel %vm384_vm2, %v382_v29, 0.0 }
  0xf1   : > { %v387_v32 = vadd.f32 %v386_v30, %v385_v31 }
  0xf3   : > { %388 = vadd.xlane.f32.xlu1 %v387_v32 }
 0x180   : > { %v389_v33 = vpop.xlane.xlu1 %388 }
 0x181   : > { %v390_v34 = vrot.slane %v389_v33, 4 }
 0x183   : > { %v391_v35 = vadd.f32 %v390_v34, %v389_v33 }
 0x185   : > { %v392_v36 = vrot.slane %v391_v35, 2 }
 0x187   : > { %v393_v37 = vadd.f32 %v392_v36, %v391_v35 }
 0x189   : > { %v394_v38 = vrot.slane %v393_v37, 1 }
 0x18b   : > { %v395_v39 = vadd.f32 %v394_v38, %v393_v37 }
 0x18d   : > { %513 = vpush %v395_v39 }
 0x1be   : > { %s514_s20 = spop %513 }
 0x1bf   : > { %s397_s21 = smul.f32 0.0016835016, %s514_s20 }
 0x1c1   : > { %s398_s22 = sadd.f32 %s397_s21, %s381_s17 }
 0x1c3   : > { %400 = sst [smem:[#allocation2]] %s398_s22 }
 0x1c4   : > { %547 = shalt.err (!%p544_p10)
}
 0x1c5   : > { %s562_s30 = smov [#allocation2]  }
 0x1c6   : > { %518 = dma.smem_to_hbm (%p522_p5), %s562_s30, 16, %s650_s5, [#allocation3]  }
 0x1c7   : > { %553 = dma.done.wait (%p522_p5), [#allocation3], 16  }
 0x1c8   : > { %555 = vsyncadd (%p522_p5), [#allocation3], 4294967280 }
 0x1c9   : > { %414 = sfence }
 0x1ca PF: > { %s16_s18 = sadd.s32 1, %s558_s18  }
 0x1cb   : > { %p13_p11 = scmp.ge.s32.totalorder %s16_s18, 4  }
 0x1cd   :  { %15 = sbr.rel (!%p13_p11) target bundleno = 1 (0x1), region = 79 }
 0x1d4   :  { %420 = vsyncpa [#allocation3], 1 }
 0x1d5   :  { %422 = vsyncpa [#allocation3 + $0x1], 1 }

// kernel: spectrum_denoise_forward.4
= control target key start
LH: loop header
LB: loop body
LE: loop exit
PB: predicated region body
PF: predicated region fallthrough
CT: control target
= control target key end

     0   :  { %s1394_s9 = smov 0   ;;  %s1546_s0 = inlined_call_operand.vmem [shape: f32[16,2,128], index: 0, kind: input, shape index: {}]   ;;  %s1547_s1 = inlined_call_operand.vmem [shape: f32[32,128], index: 1, kind: input, shape index: {}]   ;;  %s1548_s2 = inlined_call_operand.vmem [shape: f32[16,2,32], index: 2, kind: output, shape index: {}]  }
   0x1 LB: > { %s1067_s10 = sadd.s32 4294967295, %s1370_s9   ;;  %p1071_p0 = scmp.ge.s32.totalorder %s1370_s9, 1  ;;  %s1370_s9 = sphi %s1394_s9, %s12_s9  }
   0x2   : > { %p113_p1 = scmp.lt.s32.totalorder %s1370_s9, 3 }
   0x4   : > { %p114_p2 = pnand %p1071_p0, %p113_p1 }
   0x5   : > { %s1072_s11 = sshll.u32 (!%p114_p2), %s1067_s10, 3  ;;  %p1076_p4 = scmp.ne.s32.totalorder (!%p114_p2), %s1067_s10, 0 }
   0x6   : > { %117 = sbr.rel (%p114_p2) target bundleno = 5647 (0x160f), region = 28  ;;  %p136_p3 = scmp.lt.s32.totalorder (!%p114_p2), %s1072_s11, 15 }
   0xd   : > { %s1550_s11 = smov (!%p136_p3, %s1072_s11), 15  ;;  %150 = sbr.rel (%p1076_p4) target bundleno = 20 (0x14), region = 32 }
   0xe   : > { %s1073_s12 = sshll.u32 %s1550_s11, 1  ;;  %vm151_vm0 = vcmask (!%p1076_p4), 254976   ;;  %v1372_v0 = vmov (!%p1076_p4), 0.0  }
   0xf   : > { %s1405_s15 = scalar_lea.vmem %s1546_s0, %s1073_s12  ;;  %s1410_s18 = scalar_lea.vmem %s1548_s2, %s1073_s12  ;;  %152 = vst.msk [vmem:[#allocation2] sm:$0x3] (!%p1076_p4), %vm151_vm0, %v1372_v0  ;;  %153 = vst.msk [vmem:[#allocation3] sm:$0x3] (!%p1076_p4), %vm151_vm0, %v1372_v0 }
  0x14 PF: > { %v154_v1 = vld [vmem:[%s1547_s1] sm:$0xff]  ;;  %v155_v2 = vld [vmem:[%s1547_s1 + $0x8] sm:$0xff]  ;;  %v156_v3 = vld [vmem:[%s1547_s1 + $0x10] sm:$0xff]  ;;  %v1373_v4 = vmov 0.0|0.0   ;;  %vm1374_vm1 = vmmov 0   ;;  %v1375_v7 = vmov 0.0  }
  0x15   : > { %1237 = vmatprep.subr.bf16.mxu0 %v1373_v4  ;;  %v1422_v5 = vpack.c.bf16 %v155_v2, %v154_v1  ;;  %v157_v6 = vld [vmem:[%s1547_s1 + $0x18] sm:$0xff]  ;;  %1157 = vmatprep.mubr.msk.f32.mxu0 %vm1374_vm1, %v1375_v7  ;;  %vm161_vm2 = vcmask 261120   ;;  %v160_v10 = vld [vmem:[%s1405_s15] sm:$0x3]  ;;  %s1376_s27 = smov 64   ;;  %s1377_s28 = smov 32  }
  0x16   : > { %1243 = vmatprep.subr.bf16.mxu1 %v1373_v4  ;;  %1168 = vmatprep.mubr.msk.f32.mxu1 %vm1374_vm1, %v1375_v7  ;;  %v1433_v8 = vpack.c.bf16 %v157_v6, %v156_v3  ;;  %v158_v9 = vld [vmem:[#allocation2] sm:$0x3]  ;;  %v159_v15 = vld [vmem:[#allocation3] sm:$0x3]  ;;  %vm268_vm3 = vcmask 254976   ;;  %s1378_s29 = smov 96  }
  0x17   : > { %1239 = vmatpush3.bf16.msra.mxu0 %v1422_v5  ;;  %1245 = vmatpush3.bf16.msra.mxu1 %v1422_v5  ;;  %v1079_v30 = vld [vmem:[%s1405_s15 + $0x2] sm:$0x3]  ;;  %v1083_v48 = vld [vmem:[%s1405_s15 + $0x4] sm:$0x3]  ;;  %v1087_v2 = vld [vmem:[%s1405_s15 + $0x6] sm:$0x3] }
  0x18   : > { %1240 = vmatprep.subr.bf16.mxu0 %v1373_v4  ;;  %1246 = vmatprep.subr.bf16.mxu1 %v1373_v4 }
  0x1b   : > { %1242 = vmatpush3.bf16.msra.mxu0 %v1433_v8  ;;  %1248 = vmatpush3.bf16.msra.mxu1 %v1433_v8 }
  0x1c   : > { %1249 = vmatprep.subr.bf16.mxu0 %v1373_v4  ;;  %1255 = vmatprep.subr.bf16.mxu1 %v1373_v4 }
  0x1e   : > { %1158 = vmatmul.mubr.msk.f32.vlgmr.msra.gmra.mrb[0].mxu0 %vm161_vm2, %v158_v9 }
  0x1f   : > { %1251 = vmatpush3.bf16.msra.mxu0 %v1422_v5  ;;  %1179 = vmatprep.mubr.msk.f32.mxu0 %vm1374_vm1, %v1375_v7 }
  0x20   : > { %1252 = vmatprep.subr.bf16.mxu0 %v1373_v4 }
  0x23   : > { %1254 = vmatpush3.bf16.msra.mxu0 %v1433_v8 }
  0x24   : > { %1261 = vmatprep.subr.bf16.mxu0 %v1373_v4 }
  0xf1   : > { %v231_v11 = vpop.f32.mrb[0].mxu0 }
  0xf2   : > { %v235_v12 = vadd.f32 %v231_v11, %v160_v10  ;;  %v1159_v13 = vpop.f32.mrb[1].mxu0 }
  0xf4   : > { %1300 = vtanh.f32 %v235_v12  ;;  %v1078_v16 = vmul.f32 -1.442695, %v235_v12 }
  0xf6   : > { %1302 = vpow2.f32 %v1078_v16 }
  0xfe   : > { %v1301_v14 = vpop.eup %1300 }
  0xff   : > { %249 = vrot.lane.b32.xlu0 %v1301_v14, %s1376_s27 }
 0x100   : > { %v1303_v17 = vpop.eup %1302 }
 0x101   : > { %v239_v18 = vadd.f32 1.0, %v1303_v17 }
 0x103   : > { %244 = vrot.lane.b32.xlu0 %v159_v15, %s1377_s28  ;;  %1304 = vrcp.f32 %v239_v18 }
 0x10d   : > { %v1305_v19 = vpop.eup %1304 }
 0x171   : > { %v250_v20 = vpop.permute.xlu0 %249 }
 0x172   : > { %v252_v21 = vmul.f32 %v1305_v19, %v250_v20 }
 0x174   : > { %254 = vrot.lane.b32.xlu1 %v252_v21, %s1377_s28 }
 0x175   : > { %v245_v22 = vpop.permute.xlu0 %244 }
 0x176   : > { %v247_v23 = vmul.f32 %v1305_v19, %v245_v22 }
 0x1e6   : > { %v255_v24 = vpop.permute.xlu1 %254 }
 0x1e7   : > { %v257_v25 = vadd.f32 %v255_v24, %v247_v23  ;;  %v1091_v24 = vld [vmem:[%s1405_s15 + $0x8] sm:$0x3] }
 0x1e9   : > { %1306 = vtanh.f32 %v257_v25 }
 0x1f3   : > { %v1307_v26 = vpop.eup %1306 }
 0x1f4   : > { %260 = vrot.lane.b32.xlu1 %v1307_v26, %s1376_s27 }
 0x266   : > { %v261_v27 = vpop.permute.xlu1 %260 }
 0x267   : > { %v263_v28 = vmul.f32 %v1305_v19, %v261_v27 }
 0x269   : > { %265 = vrot.lane.b32.xlu0 %v263_v28, %s1377_s28 }
 0x2db   : > { %v266_v29 = vpop.permute.xlu0 %265 }
 0x2dc   : > { %269 = vst.msk [vmem:[%s1410_s18] sm:$0x3] %vm268_vm3, %v266_v29  ;;  %1169 = vmatmul.mubr.msk.f32.vlgmr.msra.gmra.mrb[0].mxu1 %vm161_vm2, %v266_v29 }
 0x2dd   : > { %1257 = vmatpush3.bf16.msra.mxu1 %v1422_v5  ;;  %1190 = vmatprep.mubr.msk.f32.mxu1 %vm1374_vm1, %v1375_v7 }
 0x2de   : > { %1258 = vmatprep.subr.bf16.mxu1 %v1373_v4 }
 0x2e1   : > { %1260 = vmatpush3.bf16.msra.mxu1 %v1433_v8 }
 0x2e2   : > { %1267 = vmatprep.subr.bf16.mxu1 %v1373_v4 }
 0x3af   : > { %v340_v31 = vpop.f32.mrb[0].mxu1 }
 0x3b0   : > { %v344_v32 = vadd.f32 %v1079_v30, %v340_v31  ;;  %v1170_v33 = vpop.f32.mrb[1].mxu1 }
 0x3b2   : > { %1308 = vtanh.f32 %v344_v32  ;;  %v1081_v35 = vmul.f32 -1.442695, %v344_v32 }
 0x3b4   : > { %1310 = vpow2.f32 %v1081_v35 }
 0x3bc   : > { %v1309_v34 = vpop.eup %1308 }
 0x3bd   : > { %354 = vrot.lane.b32.xlu1 %v1309_v34, %s1376_s27 }
 0x3be   : > { %v1311_v36 = vpop.eup %1310 }
 0x3bf   : > { %v348_v37 = vadd.f32 1.0, %v1311_v36 }
 0x3c1   : > { %1312 = vrcp.f32 %v348_v37 }
 0x3cb   : > { %v1313_v38 = vpop.eup %1312 }
 0x3cc   : > { %v352_v41 = vmul.f32 %v1313_v38, %v257_v25 }
 0x42f   : > { %v355_v39 = vpop.permute.xlu1 %354 }
 0x430   : > { %v357_v40 = vmul.f32 %v1313_v38, %v355_v39 }
 0x432   : > { %359 = vrot.lane.b32.xlu0 %v357_v40, %s1377_s28 }
 0x4a4   : > { %v360_v42 = vpop.permute.xlu0 %359 }
 0x4a5   : > { %v362_v43 = vadd.f32 %v360_v42, %v352_v41  ;;  %v1095_v42 = vld [vmem:[%s1405_s15 + $0xa] sm:$0x3] }
 0x4a7   : > { %1314 = vtanh.f32 %v362_v43 }
 0x4b1   : > { %v1315_v44 = vpop.eup %1314 }
 0x4b2   : > { %365 = vrot.lane.b32.xlu1 %v1315_v44, %s1376_s27 }
 0x524   : > { %v366_v45 = vpop.permute.xlu1 %365 }
 0x525   : > { %v368_v46 = vmul.f32 %v1313_v38, %v366_v45 }
 0x527   : > { %370 = vrot.lane.b32.xlu0 %v368_v46, %s1377_s28 }
 0x599   : > { %v371_v47 = vpop.permute.xlu0 %370 }
 0x59a   : > { %1082 = vst.msk [vmem:[%s1410_s18 + $0x2] sm:$0x3] %vm268_vm3, %v371_v47  ;;  %1180 = vmatmul.mubr.msk.f32.vlgmr.msra.gmra.mrb[2].mxu0 %vm161_vm2, %v371_v47 }
 0x59b   : > { %1263 = vmatpush3.bf16.msra.mxu0 %v1422_v5  ;;  %1201 = vmatprep.mubr.msk.f32.mxu0 %vm1374_vm1, %v1375_v7 }
 0x59c   : > { %1264 = vmatprep.subr.bf16.mxu0 %v1373_v4 }
 0x59f   : > { %1266 = vmatpush3.bf16.msra.mxu0 %v1433_v8 }
 0x5a0   : > { %1273 = vmatprep.subr.bf16.mxu0 %v1373_v4 }
 0x66d   : > { %v445_v49 = vpop.f32.mrb[2].mxu0 }
 0x66e   : > { %v449_v50 = vadd.f32 %v1083_v48, %v445_v49  ;;  %v1181_v51 = vpop.f32.mrb[3].mxu0 }
 0x670   : > { %1316 = vtanh.f32 %v449_v50  ;;  %v1085_v53 = vmul.f32 -1.442695, %v449_v50 }
 0x672   : > { %1318 = vpow2.f32 %v1085_v53 }
 0x67a   : > { %v1317_v52 = vpop.eup %1316 }
 0x67b   : > { %459 = vrot.lane.b32.xlu1 %v1317_v52, %s1376_s27 }
 0x67c   : > { %v1319_v54 = vpop.eup %1318 }
 0x67d   : > { %v453_v55 = vadd.f32 1.0, %v1319_v54 }
 0x67f   : > { %1320 = vrcp.f32 %v453_v55 }
 0x689   : > { %v1321_v56 = vpop.eup %1320 }
 0x68a   : > { %v457_v59 = vmul.f32 %v1321_v56, %v362_v43 }
 0x6ed   : > { %v460_v57 = vpop.permute.xlu1 %459 }
 0x6ee   : > { %v462_v58 = vmul.f32 %v1321_v56, %v460_v57 }
 0x6f0   : > { %464 = vrot.lane.b32.xlu0 %v462_v58, %s1377_s28 }
 0x762   : > { %v465_v60 = vpop.permute.xlu0 %464 }
 0x763   : > { %v467_v61 = vadd.f32 %v465_v60, %v457_v59 }
 0x765   : > { %1322 = vtanh.f32 %v467_v61 }
 0x76f   : > { %v1323_v62 = vpop.eup %1322 }
 0x770   : > { %470 = vrot.lane.b32.xlu1 %v1323_v62, %s1376_s27 }
 0x7e2   : > { %v471_v63 = vpop.permute.xlu1 %470 }
 0x7e3   : > { %v473_v0 = vmul.f32 %v1321_v56, %v471_v63  ;;  %v1099_v56 = vld [vmem:[%s1405_s15 + $0xc] sm:$0x3] }
 0x7e5   : > { %475 = vrot.lane.b32.xlu0 %v473_v0, %s1377_s28 }
 0x857   : > { %v476_v1 = vpop.permute.xlu0 %475 }
 0x858   : > { %1086 = vst.msk [vmem:[%s1410_s18 + $0x4] sm:$0x3] %vm268_vm3, %v476_v1  ;;  %1191 = vmatmul.mubr.msk.f32.vlgmr.msra.gmra.mrb[2].mxu1 %vm161_vm2, %v476_v1 }
 0x859   : > { %1269 = vmatpush3.bf16.msra.mxu1 %v1422_v5  ;;  %1212 = vmatprep.mubr.msk.f32.mxu1 %vm1374_vm1, %v1375_v7 }
 0x85a   : > { %1270 = vmatprep.subr.bf16.mxu1 %v1373_v4 }
 0x85d   : > { %1272 = vmatpush3.bf16.msra.mxu1 %v1433_v8 }
 0x85e   : > { %1279 = vmatprep.subr.bf16.mxu1 %v1373_v4 }
 0x92b   : > { %v550_v3 = vpop.f32.mrb[2].mxu1 }
 0x92c   : > { %v554_v6 = vadd.f32 %v1087_v2, %v550_v3  ;;  %v1192_v9 = vpop.f32.mrb[3].mxu1 }
 0x92e   : > { %1324 = vtanh.f32 %v554_v6  ;;  %v1089_v11 = vmul.f32 -1.442695, %v554_v6 }
 0x930   : > { %1326 = vpow2.f32 %v1089_v11 }
 0x938   : > { %v1325_v10 = vpop.eup %1324 }
 0x939   : > { %564 = vrot.lane.b32.xlu1 %v1325_v10, %s1376_s27 }
 0x93a   : > { %v1327_v12 = vpop.eup %1326 }
 0x93b   : > { %v558_v13 = vadd.f32 1.0, %v1327_v12 }
 0x93d   : > { %1328 = vrcp.f32 %v558_v13 }
 0x947   : > { %v1329_v14 = vpop.eup %1328 }
 0x948   : > { %v562_v17 = vmul.f32 %v1329_v14, %v467_v61 }
 0x9ab   : > { %v565_v15 = vpop.permute.xlu1 %564 }
 0x9ac   : > { %v567_v16 = vmul.f32 %v1329_v14, %v565_v15 }
 0x9ae   : > { %569 = vrot.lane.b32.xlu0 %v567_v16, %s1377_s28 }
 0xa20   : > { %v570_v18 = vpop.permute.xlu0 %569 }
 0xa21   : > { %v572_v19 = vadd.f32 %v570_v18, %v562_v17 }
 0xa23   : > { %1330 = vtanh.f32 %v572_v19 }
 0xa2d   : > { %v1331_v20 = vpop.eup %1330 }
 0xa2e   : > { %575 = vrot.lane.b32.xlu1 %v1331_v20, %s1376_s27 }
 0xaa0   : > { %v576_v21 = vpop.permute.xlu1 %575 }
 0xaa1   : > { %v578_v22 = vmul.f32 %v1329_v14, %v576_v21  ;;  %v1103_v14 = vld [vmem:[%s1405_s15 + $0xe] sm:$0x3] }
 0xaa3   : > { %580 = vrot.lane.b32.xlu0 %v578_v22, %s1377_s28 }
 0xb15   : > { %v581_v23 = vpop.permute.xlu0 %580 }
 0xb16   : > { %1090 = vst.msk [vmem:[%s1410_s18 + $0x6] sm:$0x3] %vm268_vm3, %v581_v23  ;;  %1202 = vmatmul.mubr.msk.f32.vlgmr.msra.gmra.mrb[4].mxu0 %vm161_vm2, %v581_v23 }
 0xb17   : > { %1275 = vmatpush3.bf16.msra.mxu0 %v1422_v5  ;;  %1223 = vmatprep.mubr.msk.f32.mxu0 %vm1374_vm1, %v1375_v7 }
 0xb18   : > { %1276 = vmatprep.subr.bf16.mxu0 %v1373_v4 }
 0xb1b   : > { %1278 = vmatpush3.bf16.msra.mxu0 %v1433_v8 }
 0xbe9   : > { %v655_v25 = vpop.f32.mrb[4].mxu0 }
 0xbea   : > { %v659_v26 = vadd.f32 %v1091_v24, %v655_v25  ;;  %v1203_v27 = vpop.f32.mrb[5].mxu0 }
 0xbec   : > { %1332 = vtanh.f32 %v659_v26  ;;  %v1093_v29 = vmul.f32 -1.442695, %v659_v26 }
 0xbee   : > { %1334 = vpow2.f32 %v1093_v29 }
 0xbf6   : > { %v1333_v28 = vpop.eup %1332 }
 0xbf7   : > { %669 = vrot.lane.b32.xlu1 %v1333_v28, %s1376_s27 }
 0xbf8   : > { %v1335_v30 = vpop.eup %1334 }
 0xbf9   : > { %v663_v31 = vadd.f32 1.0, %v1335_v30 }
 0xbfb   : > { %1336 = vrcp.f32 %v663_v31 }
 0xc05   : > { %v1337_v32 = vpop.eup %1336 }
 0xc06   : > { %v667_v35 = vmul.f32 %v1337_v32, %v572_v19 }
 0xc69   : > { %v670_v33 = vpop.permute.xlu1 %669 }
 0xc6a   : > { %v672_v34 = vmul.f32 %v1337_v32, %v670_v33 }
 0xc6c   : > { %674 = vrot.lane.b32.xlu0 %v672_v34, %s1377_s28 }
 0xcde   : > { %v675_v36 = vpop.permute.xlu0 %674 }
 0xcdf   : > { %v677_v37 = vadd.f32 %v675_v36, %v667_v35 }
 0xce1   : > { %1338 = vtanh.f32 %v677_v37 }
 0xceb   : > { %v1339_v38 = vpop.eup %1338 }
 0xcec   : > { %680 = vrot.lane.b32.xlu1 %v1339_v38, %s1376_s27 }
 0xd5e   : > { %v681_v39 = vpop.permute.xlu1 %680 }
 0xd5f   : > { %v683_v40 = vmul.f32 %v1337_v32, %v681_v39 }
 0xd61   : > { %685 = vrot.lane.b32.xlu0 %v683_v40, %s1377_s28 }
 0xdd3   : > { %v686_v41 = vpop.permute.xlu0 %685 }
 0xdd4   : > { %1094 = vst.msk [vmem:[%s1410_s18 + $0x8] sm:$0x3] %vm268_vm3, %v686_v41  ;;  %1213 = vmatmul.mubr.msk.f32.vlgmr.msra.gmra.mrb[4].mxu1 %vm161_vm2, %v686_v41 }
 0xdd5   : > { %1281 = vmatpush3.bf16.msra.mxu1 %v1422_v5  ;;  %1234 = vmatprep.mubr.msk.f32.mxu1 %vm1374_vm1, %v1375_v7 }
 0xdd6   : > { %1282 = vmatprep.subr.bf16.mxu1 %v1373_v4 }
 0xdd9   : > { %1284 = vmatpush3.bf16.msra.mxu1 %v1433_v8 }
 0xea7   : > { %v760_v43 = vpop.f32.mrb[4].mxu1 }
 0xea8   : > { %v764_v44 = vadd.f32 %v1095_v42, %v760_v43  ;;  %v1214_v45 = vpop.f32.mrb[5].mxu1 }
 0xeaa   : > { %1340 = vtanh.f32 %v764_v44  ;;  %v1097_v47 = vmul.f32 -1.442695, %v764_v44 }
 0xeac   : > { %1342 = vpow2.f32 %v1097_v47 }
 0xeb4   : > { %v1341_v46 = vpop.eup %1340 }
 0xeb5   : > { %774 = vrot.lane.b32.xlu1 %v1341_v46, %s1376_s27 }
 0xeb6   : > { %v1343_v48 = vpop.eup %1342 }
 0xeb7   : > { %v768_v49 = vadd.f32 1.0, %v1343_v48 }
 0xeb9   : > { %1344 = vrcp.f32 %v768_v49 }
 0xec3   : > { %v1345_v5 = vpop.eup %1344 }
 0xec4   : > { %v772_v8 = vmul.f32 %v1345_v5, %v677_v37 }
 0xf27   : > { %v775_v7 = vpop.permute.xlu1 %774 }
 0xf28   : > { %v777_v4 = vmul.f32 %v1345_v5, %v775_v7 }
 0xf2a   : > { %779 = vrot.lane.b32.xlu0 %v777_v4, %s1377_s28 }
 0xf9c   : > { %v780_v50 = vpop.permute.xlu0 %779 }
 0xf9d   : > { %v782_v51 = vadd.f32 %v780_v50, %v772_v8 }
 0xf9f   : > { %1346 = vtanh.f32 %v782_v51 }
 0xfa9   : > { %v1347_v52 = vpop.eup %1346 }
 0xfaa   : > { %785 = vrot.lane.b32.xlu1 %v1347_v52, %s1376_s27 }
0x101c   : > { %v786_v53 = vpop.permute.xlu1 %785 }
0x101d   : > { %v788_v54 = vmul.f32 %v1345_v5, %v786_v53 }
0x101f   : > { %790 = vrot.lane.b32.xlu0 %v788_v54, %s1377_s28 }
0x1091   : > { %v791_v55 = vpop.permute.xlu0 %790 }
0x1092   : > { %1098 = vst.msk [vmem:[%s1410_s18 + $0xa] sm:$0x3] %vm268_vm3, %v791_v55  ;;  %1224 = vmatmul.mubr.msk.f32.vlgmr.msra.gmra.mrb[6].mxu0 %vm161_vm2, %v791_v55 }
0x1165   : > { %v865_v57 = vpop.f32.mrb[6].mxu0 }
0x1166   : > { %v869_v58 = vadd.f32 %v1099_v56, %v865_v57  ;;  %v1225_v59 = vpop.f32.mrb[7].mxu0 }
0x1168   : > { %1348 = vtanh.f32 %v869_v58  ;;  %v1101_v61 = vmul.f32 -1.442695, %v869_v58 }
0x116a   : > { %1350 = vpow2.f32 %v1101_v61 }
0x1172   : > { %v1349_v60 = vpop.eup %1348 }
0x1173   : > { %879 = vrot.lane.b32.xlu1 %v1349_v60, %s1376_s27 }
0x1174   : > { %v1351_v62 = vpop.eup %1350 }
0x1175   : > { %v873_v63 = vadd.f32 1.0, %v1351_v62 }
0x1177   : > { %1352 = vrcp.f32 %v873_v63 }
0x1181   : > { %v1353_v0 = vpop.eup %1352 }
0x1182   : > { %v877_v3 = vmul.f32 %v1353_v0, %v782_v51 }
0x11e5   : > { %v880_v1 = vpop.permute.xlu1 %879 }
0x11e6   : > { %v882_v2 = vmul.f32 %v1353_v0, %v880_v1 }
0x11e8   : > { %884 = vrot.lane.b32.xlu0 %v882_v2, %s1377_s28 }
0x125a   : > { %v885_v6 = vpop.permute.xlu0 %884 }
0x125b   : > { %v887_v9 = vadd.f32 %v885_v6, %v877_v3 }
0x125d   : > { %1354 = vtanh.f32 %v887_v9 }
0x1267   : > { %v1355_v10 = vpop.eup %1354 }
0x1268   : > { %890 = vrot.lane.b32.xlu1 %v1355_v10, %s1376_s27 }
0x12da   : > { %v891_v11 = vpop.permute.xlu1 %890 }
0x12db   : > { %v893_v12 = vmul.f32 %v1353_v0, %v891_v11 }
0x12dd   : > { %895 = vrot.lane.b32.xlu0 %v893_v12, %s1377_s28 }
0x134f   : > { %v896_v13 = vpop.permute.xlu0 %895 }
0x1350   : > { %1102 = vst.msk [vmem:[%s1410_s18 + $0xc] sm:$0x3] %vm268_vm3, %v896_v13  ;;  %1235 = vmatmul.mubr.msk.f32.vlgmr.msra.gmra.mrb[6].mxu1 %vm161_vm2, %v896_v13 }
0x1423   : > { %v970_v15 = vpop.f32.mrb[6].mxu1 }
0x1424   : > { %v974_v16 = vadd.f32 %v1103_v14, %v970_v15  ;;  %v1236_v17 = vpop.f32.mrb[7].mxu1 }
0x1426   : > { %1356 = vtanh.f32 %v974_v16  ;;  %v1105_v19 = vmul.f32 -1.442695, %v974_v16 }
0x1428   : > { %1358 = vpow2.f32 %v1105_v19 }
0x1430   : > { %v1357_v18 = vpop.eup %1356 }
0x1431   : > { %984 = vrot.lane.b32.xlu1 %v1357_v18, %s1376_s27 }
0x1432   : > { %v1359_v20 = vpop.eup %1358 }
0x1433   : > { %v978_v21 = vadd.f32 1.0, %v1359_v20 }
0x1435   : > { %1360 = vrcp.f32 %v978_v21 }
0x143f   : > { %v1361_v22 = vpop.eup %1360 }
0x1440   : > { %v982_v25 = vmul.f32 %v1361_v22, %v887_v9 }
0x14a3   : > { %v985_v23 = vpop.permute.xlu1 %984 }
0x14a4   : > { %v987_v24 = vmul.f32 %v1361_v22, %v985_v23 }
0x14a6   : > { %989 = vrot.lane.b32.xlu0 %v987_v24, %s1377_s28 }
0x1518   : > { %v990_v26 = vpop.permute.xlu0 %989 }
0x1519   : > { %v992_v27 = vadd.f32 %v990_v26, %v982_v25 }
0x151b   : > { %1362 = vtanh.f32 %v992_v27 }
0x1525   : > { %v1363_v28 = vpop.eup %1362 }
0x1526   : > { %995 = vrot.lane.b32.xlu1 %v1363_v28, %s1376_s27 }
0x152a   : > { %1007 = vrot.lane.b32.xlu1 %v992_v27, %s1378_s29 }
0x1598   : > { %v996_v29 = vpop.permute.xlu1 %995 }
0x1599   : > { %v998_v30 = vmul.f32 %v1361_v22, %v996_v29 }
0x159b   : > { %1000 = vrot.lane.b32.xlu0 %v998_v30, %s1377_s28 }
0x159c   : > { %v1008_v31 = vpop.permute.xlu1 %1007 }
0x159d   : > { %1010 = vst.msk [vmem:[#allocation3] sm:$0x3] %vm268_vm3, %v1008_v31 }
0x160d   : > { %v1001_v32 = vpop.permute.xlu0 %1000 }
0x160e   : > { %1106 = vst.msk [vmem:[%s1410_s18 + $0xe] sm:$0x3] %vm268_vm3, %v1001_v32  ;;  %1005 = vst.msk [vmem:[#allocation2] sm:$0x3] %vm268_vm3, %v1001_v32 }
0x160f PF: > { %s12_s9 = sadd.s32 1, %s1370_s9  }
0x1610   : > { %p9_p5 = scmp.ge.s32.totalorder %s12_s9, 4  }
0x1612   :  { %11 = sbr.rel (!%p9_p5) target bundleno = 1 (0x1), region = 76 }

</bundles_post_ra>
